<compile_context>
chip_gen: v7x
topology: tpu7x:2x2x1
jax: 0.10.0
libtpu: 0.0.40
codegen_flags: <defaults>
</compile_context>

<pallas_src>
import functools

import numpy as np
import jax
import jax.numpy as jnp
from jax import lax
from jax.experimental import pallas as pl
from jax.experimental.pallas import tpu as pltpu
from scipy.optimize import linear_sum_assignment

# ----------------------------------------------------------------------------
# TrajParamIndex (layout implied by the reference slices)
# ----------------------------------------------------------------------------
X, Y, Z, VX, VY, AX, AY, YAW, LENGTH, WIDTH, HEIGHT, HAS_OBJECT, STATIC, \
    OCCLUDED, OBJECT_TYPE = range(15)
END_OF_INDEX = 15

# BEV feature layout produced by _bev_features (8 lanes)
F_MINX, F_MINY, F_MAXX, F_MAXY, F_X, F_Y, F_Z, F_SZ = range(8)
NUM_FEAT = 8

_KEY_ORDER = ('center', 'velocity', 'acceleration', 'yaw', 'size',
              'object_type', 'attributes', 'existence')


def _round_up(x, m):
    return ((x + m - 1) // m) * m


# ----------------------------------------------------------------------------
# Lane-dense XLA precompute: per-trajectory extended-box AABB + center + size.
# (Elementwise, fuses with the pad/transpose ops; removes all transcendentals
#  except the pairwise exps from the Pallas cost kernel.)
# ----------------------------------------------------------------------------
def _bev_features(traj, start_time, mid_time):
    st = start_time
    mt = mid_time
    st2 = 0.5 * st * st
    x_e = traj[..., X]
    y_e = traj[..., Y]
    vx = traj[..., VX]
    vy = traj[..., VY]
    ax = traj[..., AX]
    ay = traj[..., AY]
    length = traj[..., LENGTH]
    width = traj[..., WIDTH]
    x_s = x_e + vx * st + ax * st2
    y_s = y_e + vy * st + ay * st2
    xm = 0.5 * (x_s + x_e)
    ym = 0.5 * (y_s + y_e)
    vxm = vx + ax * mt
    vym = vy + ay * mt
    dx = x_e - x_s
    dy = y_e - y_s
    move = jnp.sqrt(dx * dx + dy * dy)
    hl = 0.5 * (length + move)
    hw = 0.5 * width
    speed = jnp.sqrt(vxm * vxm + vym * vym)
    is_static = traj[..., STATIC] > 0.5
    yaw = jnp.where((speed > 0.2) & jnp.logical_not(is_static),
                    jnp.arctan2(vym, vxm), traj[..., YAW])
    c = jnp.cos(yaw)
    s = jnp.sin(yaw)
    # min/max over the 4 rotated corners == center -/+ (|hl*c|+|hw*s|, |hl*s|+|hw*c|)
    ex = jnp.abs(hl * c) + jnp.abs(hw * s)
    ey = jnp.abs(hl * s) + jnp.abs(hw * c)
    sz = jnp.sqrt(length * length + width * width)
    return jnp.stack([xm - ex, ym - ey, xm + ex, ym + ey,
                      traj[..., X], traj[..., Y], traj[..., Z], sz], axis=-1)


# ----------------------------------------------------------------------------
# Kernel 1: pairwise trajectory BEV-IoU2 cost matrix, batched over (b, layer)
# ----------------------------------------------------------------------------
def _cost_kernel(pf_ref, gf_ref, cost_ref):
    _, _, Np, F = pf_ref.shape
    _, _, Mp = gf_ref.shape
    pf = pf_ref[...].reshape(Np, F)        # pred features: pred index on sublanes
    gf = gf_ref[...].reshape(F, Mp)        # gt features: gt index on lanes

    def P(k):                              # (Np, 1)
        return pf[:, k:k + 1]

    def G(k):                              # (1, Mp)
        return gf[k:k + 1, :]

    ix1 = jnp.maximum(P(F_MINX), G(F_MINX))        # (Np, Mp)
    iy1 = jnp.maximum(P(F_MINY), G(F_MINY))
    ix2 = jnp.minimum(P(F_MAXX), G(F_MAXX))
    iy2 = jnp.minimum(P(F_MAXY), G(F_MAXY))
    iw = jnp.maximum(ix2 - ix1, 0.0)
    ih = jnp.maximum(iy2 - iy1, 0.0)
    inter = iw * ih
    area1 = (P(F_MAXX) - P(F_MINX)) * (P(F_MAXY) - P(F_MINY))   # (Np, 1)
    area2 = (G(F_MAXX) - G(F_MINX)) * (G(F_MAXY) - G(F_MINY))   # (1, Mp)
    union = jnp.maximum(area1 + area2 - inter, 1e-8)
    iou = inter / union

    # TODO(synk): reference calculate_trajectory_distance returns a length-3
    # vector assigned to a scalar cost cell (shape bug in the reference); we
    # use its mean so the cost matrix is well-defined.
    inv_avg = 1.0 / ((P(F_SZ) + G(F_SZ)) * 0.5 + 1e-6)          # exact divide
    dist = (jnp.exp(-jnp.abs(P(F_X) - G(F_X)) * inv_avg)
            + jnp.exp(-jnp.abs(P(F_Y) - G(F_Y)) * inv_avg)
            + jnp.exp(-jnp.abs(P(F_Z) - G(F_Z)) * inv_avg)) * (1.0 / 3.0)

    score = 0.8 * iou + 0.2 * dist
    cost_ref[...] = (1000.0 * (1.0 - score)).reshape(1, 1, Np, Mp)


@functools.partial(jax.jit, static_argnums=(2, 3))
def _cost_matrices(pred_all, gt, start_time, mid_time):
    """pred_all: [L,B,N,P], gt: [B,M,P] -> cost f16 [L,B,N,M] (+ validity cols)."""
    L, B, N, _ = pred_all.shape
    M = gt.shape[1]
    Np = _round_up(N, 8)
    Mp = _round_up(M, 128)

    pred_f = pred_all.astype(jnp.float32)
    gt_f = gt.astype(jnp.float32)

    pfeat = _bev_features(pred_f, start_time, mid_time)          # (L,B,N,8)
    gfeat = _bev_features(gt_f, start_time, mid_time)            # (B,M,8)

    pf = jnp.zeros((L, B, Np, NUM_FEAT), jnp.float32).at[:, :, :N, :].set(pfeat)
    gf = jnp.zeros((B, NUM_FEAT, Mp), jnp.float32).at[:, :, :M].set(
        jnp.swapaxes(gfeat, 1, 2))

    # grid=(B, L): inner (l) axis leaves the gt block index unchanged, so the
    # gt feature tile is fetched once per b; B stays parallel for megacore.
    cost = pl.pallas_call(
        _cost_kernel,
        out_shape=jax.ShapeDtypeStruct((L, B, Np, Mp), jnp.float32),
        grid=(B, L),
        in_specs=[pl.BlockSpec((1, 1, Np, NUM_FEAT), lambda b, l: (l, b, 0, 0)),
                  pl.BlockSpec((1, NUM_FEAT, Mp), lambda b, l: (b, 0, 0))],
        out_specs=pl.BlockSpec((1, 1, Np, Mp), lambda b, l: (l, b, 0, 0)),
        compiler_params=pltpu.CompilerParams(
            dimension_semantics=("parallel", "arbitrary")),
    )(pf, gf)

    # Shrink the D2H transfer: true (N, M) extent only, f16 payload.
    cost16 = cost[:, :, :N, :M].astype(jnp.float16)
    return cost16, pred_f[..., HAS_OBJECT], gt_f[..., HAS_OBJECT]


# ----------------------------------------------------------------------------
# Kernel 2 (single grid step): all matched-pair losses + existence BCE +
# per-layer type cross-entropy + weighted total, for every (layer, batch).
# ----------------------------------------------------------------------------
def _loss_kernel(pm_ref, gm_ref, msk_ref, exl_ref, ext_ref,
                 logit_ref, label_ref, hasgt_ref, w_ref, out_ref):
    L, B, Kp, P = pm_ref.shape
    N = exl_ref.shape[2]
    _, R, C = logit_ref.shape
    Lpad, lanes = out_ref.shape

    p = pm_ref[...]                      # (L, B, Kp, P)
    g = gm_ref[...]
    m = msk_ref[...]                     # (L, B, Kp)
    m4 = m[:, :, :, None]
    cnt = jnp.maximum(jnp.sum(m, axis=2), 1.0)          # (L, B)
    d = p - g
    d2m = d * d * m4
    adm = jnp.abs(d) * m4

    def red(x):                                         # (L,B,Kp,k) -> (L,B)
        return jnp.sum(jnp.sum(x, axis=3), axis=2)

    c_lb = red(d2m[:, :, :, X:Z + 1]) / (cnt * 3.0)
    v_lb = red(d2m[:, :, :, VX:VY + 1]) / (cnt * 2.0)
    a_lb = red(adm[:, :, :, AX:AY + 1]) / (cnt * 2.0)
    yd = jnp.abs(d[:, :, :, YAW:YAW + 1])
    yd = jnp.minimum(yd, 2.0 * np.pi - yd)
    y_lb = red(yd * m4) / cnt
    s_lb = red(adm[:, :, :, LENGTH:HEIGHT + 1]) / (cnt * 3.0)

    # attributes: [HAS_OBJECT, STATIC, OCCLUDED] == contiguous slice 11:14.
    xa = p[:, :, :, HAS_OBJECT:OCCLUDED + 1]
    ta = g[:, :, :, HAS_OBJECT:OCCLUDED + 1]
    bce = jnp.maximum(xa, 0.0) - xa * ta + jnp.log(1.0 + jnp.exp(-jnp.abs(xa)))
    at_lb = red(bce * m4) / (cnt * 3.0)

    # existence BCE over the (un-filtered) N prediction slots of each group
    xl = exl_ref[...]                    # (L, B, N)
    tl = ext_ref[...]                    # (1, B, N) -> broadcasts over L
    ebce = jnp.maximum(xl, 0.0) - xl * tl + jnp.log(1.0 + jnp.exp(-jnp.abs(xl)))
    ex_lb = jnp.sum(ebce, axis=2) * (1.0 / N)           # (L, B)

    # per-layer type cross-entropy over all B*N rows (true class dim, no pad)
    logits = logit_ref[...]              # (L, R, C)
    labels = label_ref[...]              # (1, R) int32
    col = lax.broadcasted_iota(jnp.int32, (L, R, C), 2)
    onehot = col == labels[:, :, None]
    mx = jnp.max(logits, axis=2, keepdims=True)
    lse = mx + jnp.log(jnp.sum(jnp.exp(logits - mx), axis=2, keepdims=True))
    picked = jnp.sum(jnp.where(onehot, logits, 0.0), axis=2, keepdims=True)
    ce_l = jnp.sum(jnp.sum(lse - picked, axis=2), axis=1,
                   keepdims=True) * (1.0 / R)            # (L, 1)

    # batch reduction (valid_batch_count semantics of the reference)
    hg = hasgt_ref[...]                  # (1, B)
    inv_vbc = 1.0 / jnp.maximum(jnp.sum(hg), 1.0)

    def bavg(x_lb):                      # (L,B) -> (L,1)
        return jnp.sum(x_lb, axis=1, keepdims=True) * inv_vbc

    exist_l = jnp.sum(ex_lb * hg, axis=1, keepdims=True) * inv_vbc

    # key order: center, velocity, acceleration, yaw, size, object_type,
    #            attributes, existence
    comps = jnp.concatenate([bavg(c_lb), bavg(v_lb), bavg(a_lb), bavg(y_lb),
                             bavg(s_lb), ce_l, bavg(at_lb), exist_l],
                            axis=1)                       # (L, 8)

    total = jnp.sum(w_ref[...] * comps)                   # weighted total loss
    packed = jnp.concatenate(
        [comps, jnp.broadcast_to(jnp.reshape(total, (1, 1)), (L, 1))],
        axis=1)                                           # (L, 9)

    full = packed
    if Lpad > L:
        full = jnp.concatenate(
            [full, jnp.zeros((Lpad - L, 9), jnp.float32)], axis=0)
    full = jnp.concatenate(
        [full, jnp.zeros((Lpad, lanes - 9), jnp.float32)], axis=1)
    out_ref[...] = full


@jax.jit
def _device_losses(pred_all, gt, logits_all, pm_idx, gm_idx, pair_mask,
                   target_ex, has_gt, wl):
    L, B, N, P = pred_all.shape
    M = gt.shape[1]
    C = logits_all.shape[-1]
    Kp = pm_idx.shape[-1]
    R = B * N
    Lpad = max(8, _round_up(L, 8))

    pred_f = pred_all.astype(jnp.float32)
    gt_f = gt.astype(jnp.float32)

    # ---- gather matched pairs (host supplied fixed-size index arrays) ------
    # TODO(synk): could move this gather in-kernel via scalar prefetch; at these
    # sizes the XLA gather is a single tiny fused op, so it stays here.
    pm = jnp.take_along_axis(
        pred_f, jnp.broadcast_to(pm_idx[..., None], (L, B, Kp, P)), axis=2)
    gt_b = jnp.broadcast_to(gt_f[None], (L, B, M, P))
    gm = jnp.take_along_axis(
        gt_b, jnp.broadcast_to(gm_idx[..., None], (L, B, Kp, P)), axis=2)

    msk = pair_mask.astype(jnp.float32)                   # (L, B, Kp)
    exl = pred_f[..., HAS_OBJECT]                         # (L, B, N)
    ext = target_ex.astype(jnp.float32)[None]             # (1, B, N)
    logits = logits_all.astype(jnp.float32).reshape(L, R, C)
    labels = gt_f[..., OBJECT_TYPE].astype(jnp.int32).reshape(1, B * M)
    hg = has_gt.astype(jnp.float32).reshape(1, B)
    wl = wl.astype(jnp.float32)                           # (L, 8)

    out = pl.pallas_call(
        _loss_kernel,
        out_shape=jax.ShapeDtypeStruct((Lpad, 128), jnp.float32),
    )(pm, gm, msk, exl, ext, logits, labels, hg, wl)
    return out


# ----------------------------------------------------------------------------
# TrajectoryLoss in JAX + Pallas
# ----------------------------------------------------------------------------
class TrajectoryLossPallas:
    def __init__(self, weight_dict=None, frames: int = 10, dt: float = 0.1,
                 iou_method: str = 'iou2', aux_loss_weight: float = 0.5):
        self.weight_dict = weight_dict if weight_dict is not None else {
            'center': 1.0, 'velocity': 1.0, 'acceleration': 0.5, 'yaw': 1.0,
            'size': 1.0, 'object_type': 0.5, 'attributes': 0.5, 'existence': 2.0}
        self.frames = frames
        self.dt = dt
        self.iou_method = iou_method
        self.aux_loss_weight = aux_loss_weight
        if iou_method != 'iou2':
            # TODO(synk): only the default 'iou2' matcher is implemented as a kernel.
            raise NotImplementedError("only iou_method='iou2' is implemented")

    def _weights(self, L):
        """[L, 8] combined (layer factor * key weight) matrix (reference math)."""
        W = np.zeros((L, 8), np.float32)
        lf = np.zeros((L,), np.float32)
        for j, k in enumerate(_KEY_ORDER):
            W[L - 1, j] = self.weight_dict.get(k, 1.0)
        lf[L - 1] = 1.0
        for i in range(L - 1):
            lf[i] = self.aux_loss_weight ** (L - 2 - i)
            for j, k in enumerate(_KEY_ORDER):
                # reference quirk: aux weight looked up by key.split('_')[-1]
                W[i, j] = self.weight_dict.get(f'aux_{i}_{k}'.split('_')[-1], 1.0)
        return (lf[:, None] * W).astype(np.float32)

    def __call__(self, outputs, targets):
        gt = jnp.asarray(targets['trajs'], jnp.float32)                     # [B,M,P]
        L = len(outputs)
        pred_all = jnp.stack(
            [jnp.asarray(o['traj_params'], jnp.float32) for o in outputs])  # [L,B,N,P]
        logits_all = jnp.stack(
            [jnp.asarray(o['type_logits'], jnp.float32) for o in outputs])  # [L,B,N,C]

        B, M, P = gt.shape
        N = pred_all.shape[2]
        assert P == END_OF_INDEX
        assert N == M, "reference's global type CE (view(-1)) requires N == M"

        start_time = -self.dt * (self.frames - 1)      # frames[0]
        mid_time = start_time * 0.5                    # (frames[0] + frames[-1]) / 2

        # 1) batched pairwise cost matrices (one pallas_call for all (b, l))
        cost, pred_has, gt_has = _cost_matrices(
            pred_all, gt, float(start_time), float(mid_time))

        # 2) single (small, f16) device->host sync, Hungarian matching on host
        cost_np, pred_has_np, gt_has_np = jax.device_get((cost, pred_has, gt_has))

        Kp = max(8, _round_up(min(N, M), 8))           # fixed, shape-derived
        pm_idx = np.zeros((L, B, Kp), np.int32)
        gm_idx = np.zeros((L, B, Kp), np.int32)
        pair_mask = np.zeros((L, B, Kp), np.float32)
        target_ex = np.zeros((B, N), np.float32)
        has_gt = np.zeros((B,), np.float32)
        for b in range(B):
            gt_valid = np.nonzero(gt_has_np[b] > 0.5)[0]
            if gt_valid.size == 0:
                continue
            has_gt[b] = 1.0
            target_ex[b, :gt_valid.size] = 1.0
            for l in range(L):
                pred_valid = np.nonzero(pred_has_np[l, b] > 0.5)[0]
                if pred_valid.size == 0:
                    continue
                sub = cost_np[l, b][np.ix_(pred_valid, gt_valid)].astype(np.float32)
                pi, gi = linear_sum_assignment(sub)
                k = int(pi.shape[0])
                if k == 0:
                    continue
                pm_idx[l, b, :k] = pred_valid[pi]
                gm_idx[l, b, :k] = gt_valid[gi]
                pair_mask[l, b, :k] = 1.0

        # 3) one jitted device pass: gather + single fused loss kernel
        wl = self._weights(L)
        out = _device_losses(
            pred_all, gt, logits_all,
            jnp.asarray(pm_idx), jnp.asarray(gm_idx), jnp.asarray(pair_mask),
            jnp.asarray(target_ex), jnp.asarray(has_gt), jnp.asarray(wl))

        comps = out[:L, :8]                # per-layer components (key order)
        total = out[0, 8]                  # weighted total computed in-kernel

        # Build the loss dict exactly like the reference.
        # TODO(synk): degenerate 1-class matched CE omitted (exactly 0 in torch
        # and overwritten by the global type CE in the reference).
        losses = {}
        for j, k in enumerate(_KEY_ORDER):
            losses[k] = comps[L - 1, j]
        for i in range(L - 1):
            for j, k in enumerate(_KEY_ORDER):
                losses[f'aux_{i}_{k}'] = comps[i, j]
        losses['loss'] = total
        return losses


# ----------------------------------------------------------------------------
# Example run
# ----------------------------------------------------------------------------
if __name__ == "__main__":
    B, N, M, C = 2, 8, 8, 10          # batch, pred queries, gt slots, object types
    P = END_OF_INDEX                  # 15 trajectory params

    key = jax.random.PRNGKey(0)
    kg, kn0, kn1, kt0, kt1 = jax.random.split(key, 5)

    base = np.asarray(jax.random.normal(kg, (B, M, P), dtype=jnp.float32))
    gt = np.zeros((B, M, P), np.float32)
    gt[..., X] = base[..., X] * 10.0
    gt[..., Y] = base[..., Y] * 10.0
    gt[..., Z] = base[..., Z] * 0.5
    gt[..., VX] = base[..., VX] * 3.0
    gt[..., VY] = base[..., VY] * 3.0
    gt[..., AX] = base[..., AX] * 0.5
    gt[..., AY] = base[..., AY] * 0.5
    gt[..., YAW] = base[..., YAW]
    gt[..., LENGTH] = np.abs(base[..., LENGTH]) * 2.0 + 2.0
    gt[..., WIDTH] = np.abs(base[..., WIDTH]) + 1.0
    gt[..., HEIGHT] = np.abs(base[..., HEIGHT]) + 1.0
    gt[..., HAS_OBJECT] = 0.0
    gt[:, :5, HAS_OBJECT] = 1.0
    gt[..., STATIC] = (base[..., STATIC] > 0.0).astype(np.float32)
    gt[..., OCCLUDED] = (base[..., OCCLUDED] > 0.0).astype(np.float32)
    gt[..., OBJECT_TYPE] = 0.0        # class 0 so the reference's 1-class CE is defined

    def make_pred(k_noise, k_type):
        noise = np.asarray(jax.random.normal(k_noise, (B, N, P), dtype=jnp.float32))
        pred = gt + 0.3 * noise
        # existence logits: high for slots that have a gt object, low otherwise
        pred[..., HAS_OBJECT] = gt[..., HAS_OBJECT] * 2.0 - 0.5 + 0.3 * noise[..., HAS_OBJECT]
        tl = np.asarray(jax.random.normal(k_type, (B, N, C), dtype=jnp.float32))
        return {'traj_params': jnp.asarray(pred), 'type_logits': jnp.asarray(tl)}

    outputs = [make_pred(kn0, kt0), make_pred(kn1, kt1)]   # aux layer + final layer
    targets = {'trajs': jnp.asarray(gt)}

    loss_fn = TrajectoryLossPallas()
    losses = loss_fn(outputs, targets)
    jax.block_until_ready(losses['loss'])
    print("KERNEL_OK")
</pallas_src>

<mosaic_0001>
module attributes {stable_mosaic.version = 11 : i64} {
  func.func @_cost_kernel(%arg0: i32, %arg1: i32, %arg2: memref<1x1x8x8xf32, #tpu.memory_space<vmem>>, %arg3: memref<1x8x128xf32, #tpu.memory_space<vmem>>, %arg4: memref<1x1x8x128xf32, #tpu.memory_space<vmem>>) attributes {dimension_semantics = [#tpu.dimension_semantics<parallel>, #tpu.dimension_semantics<arbitrary>], iteration_bounds = array<i64: 2, 2>, scalar_prefetch = 0 : i64, scratch_operands = 0 : i64, tpu.core_type = #tpu.core_type<tc>, window_params = [{transform_indices = @transform_0, window_bounds = array<i64: 1, 1, 8, 8>}, {transform_indices = @transform_1, window_bounds = array<i64: 1, 8, 128>}, {transform_indices = @transform_2, window_bounds = array<i64: 1, 1, 8, 128>}]} {
    %c0 = arith.constant 0 : index
    %c0_0 = arith.constant 0 : index
    %c0_1 = arith.constant 0 : index
    %c0_2 = arith.constant 0 : index
    %0 = vector.load %arg2[%c0, %c0_0, %c0_1, %c0_2] : memref<1x1x8x8xf32, #tpu.memory_space<vmem>>, vector<1x1x8x8xf32>
    %1 = vector.shape_cast %0 : vector<1x1x8x8xf32> to vector<8x8xf32>
    %c0_3 = arith.constant 0 : index
    %c0_4 = arith.constant 0 : index
    %c0_5 = arith.constant 0 : index
    %2 = vector.load %arg3[%c0_3, %c0_4, %c0_5] : memref<1x8x128xf32, #tpu.memory_space<vmem>>, vector<1x8x128xf32>
    %3 = vector.shape_cast %2 : vector<1x8x128xf32> to vector<8x128xf32>
    %4 = vector.extract_strided_slice %1 {offsets = [0, 0], sizes = [8, 1], strides = [1, 1]} : vector<8x8xf32> to vector<8x1xf32>
    %5 = vector.extract_strided_slice %3 {offsets = [0, 0], sizes = [1, 128], strides = [1, 1]} : vector<8x128xf32> to vector<1x128xf32>
    %6 = vector.broadcast %4 : vector<8x1xf32> to vector<8x128xf32>
    %7 = vector.broadcast %5 : vector<1x128xf32> to vector<8x128xf32>
    %8 = arith.maximumf %6, %7 : vector<8x128xf32>
    %9 = vector.extract_strided_slice %1 {offsets = [0, 1], sizes = [8, 1], strides = [1, 1]} : vector<8x8xf32> to vector<8x1xf32>
    %10 = vector.extract_strided_slice %3 {offsets = [1, 0], sizes = [1, 128], strides = [1, 1]} : vector<8x128xf32> to vector<1x128xf32>
    %11 = vector.broadcast %9 : vector<8x1xf32> to vector<8x128xf32>
    %12 = vector.broadcast %10 : vector<1x128xf32> to vector<8x128xf32>
    %13 = arith.maximumf %11, %12 : vector<8x128xf32>
    %14 = vector.extract_strided_slice %1 {offsets = [0, 2], sizes = [8, 1], strides = [1, 1]} : vector<8x8xf32> to vector<8x1xf32>
    %15 = vector.extract_strided_slice %3 {offsets = [2, 0], sizes = [1, 128], strides = [1, 1]} : vector<8x128xf32> to vector<1x128xf32>
    %16 = vector.broadcast %14 : vector<8x1xf32> to vector<8x128xf32>
    %17 = vector.broadcast %15 : vector<1x128xf32> to vector<8x128xf32>
    %18 = arith.minimumf %16, %17 : vector<8x128xf32>
    %19 = vector.extract_strided_slice %1 {offsets = [0, 3], sizes = [8, 1], strides = [1, 1]} : vector<8x8xf32> to vector<8x1xf32>
    %20 = vector.extract_strided_slice %3 {offsets = [3, 0], sizes = [1, 128], strides = [1, 1]} : vector<8x128xf32> to vector<1x128xf32>
    %21 = vector.broadcast %19 : vector<8x1xf32> to vector<8x128xf32>
    %22 = vector.broadcast %20 : vector<1x128xf32> to vector<8x128xf32>
    %23 = arith.minimumf %21, %22 : vector<8x128xf32>
    %24 = arith.subf %18, %8 : vector<8x128xf32>
    %cst = arith.constant 0.000000e+00 : f32
    %25 = vector.broadcast %cst : f32 to vector<8x128xf32>
    %26 = arith.maximumf %24, %25 : vector<8x128xf32>
    %27 = arith.subf %23, %13 : vector<8x128xf32>
    %cst_6 = arith.constant 0.000000e+00 : f32
    %28 = vector.broadcast %cst_6 : f32 to vector<8x128xf32>
    %29 = arith.maximumf %27, %28 : vector<8x128xf32>
    %30 = arith.mulf %26, %29 : vector<8x128xf32>
    %31 = vector.extract_strided_slice %1 {offsets = [0, 2], sizes = [8, 1], strides = [1, 1]} : vector<8x8xf32> to vector<8x1xf32>
    %32 = vector.extract_strided_slice %1 {offsets = [0, 0], sizes = [8, 1], strides = [1, 1]} : vector<8x8xf32> to vector<8x1xf32>
    %33 = arith.subf %31, %32 : vector<8x1xf32>
    %34 = vector.extract_strided_slice %1 {offsets = [0, 3], sizes = [8, 1], strides = [1, 1]} : vector<8x8xf32> to vector<8x1xf32>
    %35 = vector.extract_strided_slice %1 {offsets = [0, 1], sizes = [8, 1], strides = [1, 1]} : vector<8x8xf32> to vector<8x1xf32>
    %36 = arith.subf %34, %35 : vector<8x1xf32>
    %37 = arith.mulf %33, %36 : vector<8x1xf32>
    %38 = vector.extract_strided_slice %3 {offsets = [2, 0], sizes = [1, 128], strides = [1, 1]} : vector<8x128xf32> to vector<1x128xf32>
    %39 = vector.extract_strided_slice %3 {offsets = [0, 0], sizes = [1, 128], strides = [1, 1]} : vector<8x128xf32> to vector<1x128xf32>
    %40 = arith.subf %38, %39 : vector<1x128xf32>
    %41 = vector.extract_strided_slice %3 {offsets = [3, 0], sizes = [1, 128], strides = [1, 1]} : vector<8x128xf32> to vector<1x128xf32>
    %42 = vector.extract_strided_slice %3 {offsets = [1, 0], sizes = [1, 128], strides = [1, 1]} : vector<8x128xf32> to vector<1x128xf32>
    %43 = arith.subf %41, %42 : vector<1x128xf32>
    %44 = arith.mulf %40, %43 : vector<1x128xf32>
    %45 = vector.broadcast %37 : vector<8x1xf32> to vector<8x128xf32>
    %46 = vector.broadcast %44 : vector<1x128xf32> to vector<8x128xf32>
    %47 = arith.addf %45, %46 : vector<8x128xf32>
    %48 = arith.subf %47, %30 : vector<8x128xf32>
    %cst_7 = arith.constant 9.99999993E-9 : f32
    %49 = vector.broadcast %cst_7 : f32 to vector<8x128xf32>
    %50 = arith.maximumf %48, %49 : vector<8x128xf32>
    %51 = arith.divf %30, %50 : vector<8x128xf32>
    %52 = vector.extract_strided_slice %1 {offsets = [0, 7], sizes = [8, 1], strides = [1, 1]} : vector<8x8xf32> to vector<8x1xf32>
    %53 = vector.extract_strided_slice %3 {offsets = [7, 0], sizes = [1, 128], strides = [1, 1]} : vector<8x128xf32> to vector<1x128xf32>
    %54 = vector.broadcast %52 : vector<8x1xf32> to vector<8x128xf32>
    %55 = vector.broadcast %53 : vector<1x128xf32> to vector<8x128xf32>
    %56 = arith.addf %54, %55 : vector<8x128xf32>
    %cst_8 = arith.constant 5.000000e-01 : f32
    %57 = vector.broadcast %cst_8 : f32 to vector<8x128xf32>
    %58 = arith.mulf %56, %57 : vector<8x128xf32>
    %cst_9 = arith.constant 9.99999997E-7 : f32
    %59 = vector.broadcast %cst_9 : f32 to vector<8x128xf32>
    %60 = arith.addf %58, %59 : vector<8x128xf32>
    %cst_10 = arith.constant 1.000000e+00 : f32
    %61 = vector.broadcast %cst_10 : f32 to vector<8x128xf32>
    %62 = arith.divf %61, %60 : vector<8x128xf32>
    %63 = vector.extract_strided_slice %1 {offsets = [0, 4], sizes = [8, 1], strides = [1, 1]} : vector<8x8xf32> to vector<8x1xf32>
    %64 = vector.extract_strided_slice %3 {offsets = [4, 0], sizes = [1, 128], strides = [1, 1]} : vector<8x128xf32> to vector<1x128xf32>
    %65 = vector.broadcast %63 : vector<8x1xf32> to vector<8x128xf32>
    %66 = vector.broadcast %64 : vector<1x128xf32> to vector<8x128xf32>
    %67 = arith.subf %65, %66 : vector<8x128xf32>
    %68 = math.absf %67 : vector<8x128xf32>
    %cst_11 = arith.constant 0.000000e+00 : f32
    %69 = vector.broadcast %cst_11 : f32 to vector<8x128xf32>
    %70 = arith.subf %69, %68 : vector<8x128xf32>
    %71 = arith.mulf %70, %62 : vector<8x128xf32>
    %72 = math.exp %71 : vector<8x128xf32>
    %73 = vector.extract_strided_slice %1 {offsets = [0, 5], sizes = [8, 1], strides = [1, 1]} : vector<8x8xf32> to vector<8x1xf32>
    %74 = vector.extract_strided_slice %3 {offsets = [5, 0], sizes = [1, 128], strides = [1, 1]} : vector<8x128xf32> to vector<1x128xf32>
    %75 = vector.broadcast %73 : vector<8x1xf32> to vector<8x128xf32>
    %76 = vector.broadcast %74 : vector<1x128xf32> to vector<8x128xf32>
    %77 = arith.subf %75, %76 : vector<8x128xf32>
    %78 = math.absf %77 : vector<8x128xf32>
    %cst_12 = arith.constant 0.000000e+00 : f32
    %79 = vector.broadcast %cst_12 : f32 to vector<8x128xf32>
    %80 = arith.subf %79, %78 : vector<8x128xf32>
    %81 = arith.mulf %80, %62 : vector<8x128xf32>
    %82 = math.exp %81 : vector<8x128xf32>
    %83 = arith.addf %72, %82 : vector<8x128xf32>
    %84 = vector.extract_strided_slice %1 {offsets = [0, 6], sizes = [8, 1], strides = [1, 1]} : vector<8x8xf32> to vector<8x1xf32>
    %85 = vector.extract_strided_slice %3 {offsets = [6, 0], sizes = [1, 128], strides = [1, 1]} : vector<8x128xf32> to vector<1x128xf32>
    %86 = vector.broadcast %84 : vector<8x1xf32> to vector<8x128xf32>
    %87 = vector.broadcast %85 : vector<1x128xf32> to vector<8x128xf32>
    %88 = arith.subf %86, %87 : vector<8x128xf32>
    %89 = math.absf %88 : vector<8x128xf32>
    %cst_13 = arith.constant 0.000000e+00 : f32
    %90 = vector.broadcast %cst_13 : f32 to vector<8x128xf32>
    %91 = arith.subf %90, %89 : vector<8x128xf32>
    %92 = arith.mulf %91, %62 : vector<8x128xf32>
    %93 = math.exp %92 : vector<8x128xf32>
    %94 = arith.addf %83, %93 : vector<8x128xf32>
    %cst_14 = arith.constant 0.333333343 : f32
    %95 = vector.broadcast %cst_14 : f32 to vector<8x128xf32>
    %96 = arith.mulf %94, %95 : vector<8x128xf32>
    %cst_15 = arith.constant 8.000000e-01 : f32
    %97 = vector.broadcast %cst_15 : f32 to vector<8x128xf32>
    %98 = arith.mulf %97, %51 : vector<8x128xf32>
    %cst_16 = arith.constant 2.000000e-01 : f32
    %99 = vector.broadcast %cst_16 : f32 to vector<8x128xf32>
    %100 = arith.mulf %99, %96 : vector<8x128xf32>
    %101 = arith.addf %98, %100 : vector<8x128xf32>
    %cst_17 = arith.constant 1.000000e+00 : f32
    %102 = vector.broadcast %cst_17 : f32 to vector<8x128xf32>
    %103 = arith.subf %102, %101 : vector<8x128xf32>
    %cst_18 = arith.constant 1.000000e+03 : f32
    %104 = vector.broadcast %cst_18 : f32 to vector<8x128xf32>
    %105 = arith.mulf %104, %103 : vector<8x128xf32>
    %106 = vector.shape_cast %105 : vector<8x128xf32> to vector<1x1x8x128xf32>
    %c0_19 = arith.constant 0 : index
    %c0_20 = arith.constant 0 : index
    %c0_21 = arith.constant 0 : index
    %c0_22 = arith.constant 0 : index
    %107 = vector.load %arg4[%c0_19, %c0_20, %c0_21, %c0_22] : memref<1x1x8x128xf32, #tpu.memory_space<vmem>>, vector<1x1x8x128xf32>
    tpu.vector_store %arg4[%c0_19, %c0_20, %c0_21, %c0_22], %106 {strides = array<i32>} : memref<1x1x8x128xf32, #tpu.memory_space<vmem>>, vector<1x1x8x128xf32>,
    return
  }
  func.func @transform_0(%arg0: i32, %arg1: i32) -> (i32, i32, i32, i32) {
    %c0_i32 = arith.constant 0 : i32
    %c0_i32_0 = arith.constant 0 : i32
    %c0_i32_1 = arith.constant 0 : i32
    return %arg1, %arg0, %c0_i32, %c0_i32_0 : i32, i32, i32, i32
  }
  func.func @transform_1(%arg0: i32, %arg1: i32) -> (i32, i32, i32) {
    %c0_i32 = arith.constant 0 : i32
    %c0_i32_0 = arith.constant 0 : i32
    %c0_i32_1 = arith.constant 0 : i32
    return %arg0, %c0_i32, %c0_i32_0 : i32, i32, i32
  }
  func.func @transform_2(%arg0: i32, %arg1: i32) -> (i32, i32, i32, i32) {
    %c0_i32 = arith.constant 0 : i32
    %c0_i32_0 = arith.constant 0 : i32
    %c0_i32_1 = arith.constant 0 : i32
    return %arg1, %arg0, %c0_i32, %c0_i32_0 : i32, i32, i32, i32
  }
}

</mosaic_0001>

<bundles_post_ra>
// kernel: sin.0
= control target key start
LH: loop header
LB: loop body
LE: loop exit
PB: predicated region body
PF: predicated region fallthrough
CT: control target
= control target key end

     0   :  { %v492_v30 = vmov 683565275   ;;  %v493_v32 = vmov 2475754826   ;;  %v494_v34 = vmov 2131351028   ;;  %s837_s0 = inlined_call_operand.vmem [shape: f32[2,2,8,1], index: 0, kind: input, shape index: {}]   ;;  %s838_s1 = inlined_call_operand.vmem [shape: f32[2,2,8,1], index: 1, kind: output, shape index: {}]  }
   0x1   :  { %v511_v0 = vld [vmem:[%s837_s0] sm:$0xff]  ;;  %v516_v1 = vld [vmem:[%s837_s0 + $0x10] sm:$0xff]  ;;  %v525_v6 = vld [vmem:[%s837_s0 + $0x8] sm:$0xff]  ;;  %v495_v36 = vmov 2102212464  }
   0x2   :  { %v3_v2 = vand.u32 2147483647, %v511_v0  ;;  %v6_v3 = vand.u32 2139095040, %v511_v0  ;;  %v110_v4 = vand.u32 2147483647, %v516_v1  ;;  %v113_v5 = vand.u32 2139095040, %v516_v1 }
   0x3   :  { %v221_v12 = vand.u32 2139095040, %v525_v6  ;;  %v218_v24 = vand.u32 2147483647, %v525_v6  ;;  %v496_v38 = vmov 920167782   ;;  %vm5_vm13 = vcmp.lt.s32.totalorder %v511_v0, 0 }
   0x4   :  { %v7_v7 = vshrl.u32 %v6_v3, 23  ;;  %v10_v8 = vand.u32 8388607, %v3_v2  ;;  %v114_v9 = vshrl.u32 %v113_v5, 23  ;;  %v117_v10 = vand.u32 8388607, %v110_v4 }
   0x5   :  { %v222_v15 = vshrl.u32 %v221_v12, 23  ;;  %v497_v46 = vmov 1326507024  }
   0x6   :  { %v432_v11 = vadd.s32 4294967169, %v7_v7  ;;  %v437_v13 = vadd.s32 4294967169, %v114_v9  ;;  %v11_v16 = vor.u32 8388608, %v10_v8  ;;  %v118_v17 = vor.u32 8388608, %v117_v10 }
   0x7   :  { %v443_v19 = vadd.s32 4294967169, %v222_v15 }
   0x8   :  { %v13_v14 = vadd.s32 1, %v432_v11  ;;  %v120_v18 = vadd.s32 1, %v437_v13  ;;  %v533_v25 = vshll.u32 %v11_v16, 8  ;;  %v535_v27 = vshll.u32 %v118_v17, 8 }
   0x9   :  { %v537_v28 = vadd.s32 1, %v443_v19 }
   0xa   :  { %vm14_vm0 = vcmp.gt.s32.totalorder %v13_v14, 0  ;;  %vm121_vm1 = vcmp.gt.s32.totalorder %v120_v18, 0 }
   0xb   :  { %v15_v20 = vsel %vm14_vm0, %v13_v14, 0  ;;  %v122_v23 = vsel %vm121_vm1, %v120_v18, 0  ;;  %vm229_vm11 = vcmp.gt.s32.totalorder %v537_v28, 0  ;;  %vm653_vm0 = vcmp.le.f32.partialorder %v3_v2, 0.7853982 }
   0xc   :  { %v16_v21 = vshrl.u32 %v15_v20, 5  ;;  %v17_v22 = vand.u32 31, %v15_v20  ;;  %v124_v26 = vand.u32 31, %v122_v23  ;;  %v544_v40 = vshrl.u32 %v122_v23, 5 }
   0xd   :  { %v230_v28 = vsel %vm229_vm11, %v537_v28, 0 }
   0xe   :  { %v18_v29 = vsub.s32 32, %v17_v22  ;;  %v20_v31 = vshll.u32 %v492_v30, %v17_v22  ;;  %v23_v33 = vshll.u32 %v493_v32, %v17_v22  ;;  %v26_v35 = vshll.u32 %v494_v34, %v17_v22 }
   0xf   :  { %v29_v37 = vshll.u32 %v495_v36, %v17_v22  ;;  %v32_v39 = vshll.u32 %v496_v38, %v17_v22  ;;  %vm35_vm2 = vcmp.lt.s32.totalorder %v16_v21, 1  ;;  %vm36_vm3 = vcmp.lt.s32.totalorder %v16_v21, 2 }
  0x10   :  { %v19_v41 = vshrl.u32 %v492_v30, %v18_v29  ;;  %v21_v42 = vshrl.u32 %v493_v32, %v18_v29  ;;  %v24_v43 = vshrl.u32 %v494_v34, %v18_v29  ;;  %v27_v44 = vshrl.u32 %v495_v36, %v18_v29 }
  0x11   :  { %v30_v45 = vshrl.u32 %v496_v38, %v18_v29  ;;  %v33_v47 = vshrl.u32 %v497_v46, %v18_v29  ;;  %vm38_vm4 = vcmp.lt.s32.totalorder %v16_v21, 4  ;;  %v125_v51 = vsub.s32 32, %v124_v26 }
  0x12   :  { %v22_v48 = vor.u32 %v21_v42, %v20_v31  ;;  %v25_v49 = vor.u32 %v24_v43, %v23_v33  ;;  %v28_v50 = vor.u32 %v27_v44, %v26_v35  ;;  %vm37_vm5 = vcmp.lt.s32.totalorder %v16_v21, 3 }
  0x13   :  { %v31_v52 = vor.u32 %v30_v45, %v29_v37  ;;  %v34_v53 = vor.u32 %v33_v47, %v32_v39  ;;  %v127_v54 = vshll.u32 %v492_v30, %v124_v26  ;;  %v130_v62 = vshll.u32 %v493_v32, %v124_v26 }
  0x14   :  { %v39_v55 = vsel %vm35_vm2, %v19_v41, %v22_v48  ;;  %v40_v56 = vsel %vm38_vm4, %v28_v50, 2102212464  ;;  %v43_v57 = vsel %vm35_vm2, %v22_v48, %v25_v49  ;;  %v47_v58 = vsel %vm35_vm2, %v25_v49, %v28_v50 }
  0x15   :  { %v41_v59 = vsel %vm37_vm5, %v25_v49, %v40_v56  ;;  %v44_v60 = vsel %vm38_vm4, %v31_v52, 920167782  ;;  %v48_v61 = vsel %vm38_vm4, %v34_v53, 1326507024  ;;  %v126_v5 = vshrl.u32 %v492_v30, %v125_v51 }
  0x16   :  { %v45_v63 = vsel %vm37_vm5, %v28_v50, %v44_v60  ;;  %v49_v3 = vsel %vm37_vm5, %v31_v52, %v48_v61  ;;  %v128_v7 = vshrl.u32 %v493_v32, %v125_v51  ;;  %v42_v8 = vsel %vm36_vm3, %v39_v55, %v41_v59 }
  0x17   :  { %v46_v9 = vsel %vm36_vm3, %v43_v57, %v45_v63  ;;  %v50_v10 = vsel %vm36_vm3, %v47_v58, %v49_v3  ;;  %v131_v11 = vshrl.u32 %v494_v34, %v125_v51  ;;  %v133_v18 = vshll.u32 %v494_v34, %v124_v26 }
  0x18   :  { %v564_v12 = vmul.u32.u64.low %v533_v25, %v50_v10  ;;  %v565_v13 = vmul.u32.u64.high %v533_v25, %v50_v10, %v564_v12  ;;  %v568_v14 = vmul.u32.u64.low %v533_v25, %v46_v9  ;;  %v569_v15 = vmul.u32.u64.high %v533_v25, %v46_v9, %v568_v14 }
  0x19   :  { %v129_v16 = vor.u32 %v128_v7, %v127_v54  ;;  %v132_v17 = vor.u32 %v131_v11, %v130_v62  ;;  %v134_v19 = vshrl.u32 %v495_v36, %v125_v51  ;;  %v136_v20 = vshll.u32 %v495_v36, %v124_v26  ;;  %v614_v62 = vld [vmem:[%s837_s0 + $0x18] sm:$0xff] }
  0x1a   :  { %v137_v21 = vshrl.u32 %v496_v38, %v125_v51  ;;  %v139_v22 = vshll.u32 %v496_v38, %v124_v26  ;;  %v140_v23 = vshrl.u32 %v497_v46, %v125_v51  ;;  %v58_v25 = vmul.u32 %v533_v25, %v42_v8 }
  0x1b   :  { %v135_v26 = vor.u32 %v134_v19, %v133_v18  ;;  %vm142_vm6 = vcmp.lt.s32.totalorder %v544_v40, 1  ;;  %vm143_vm7 = vcmp.lt.s32.totalorder %v544_v40, 2  ;;  %vm60_vm8 = vc.u32 %v565_v13, %v568_v14 }
  0x1c   :  { %v61_v29 = vadd.s32 1, %v569_v15  ;;  %v138_v31 = vor.u32 %v137_v21, %v136_v20  ;;  %vm144_vm9 = vcmp.lt.s32.totalorder %v544_v40, 3  ;;  %v141_v33 = vor.u32 %v140_v23, %v139_v22 }
  0x1d   :  { %vm145_vm10 = vcmp.lt.s32.totalorder %v544_v40, 4  ;;  %v146_v35 = vsel %vm142_vm6, %v126_v5, %v129_v16  ;;  %v150_v37 = vsel %vm142_vm6, %v129_v16, %v132_v17  ;;  %v154_v43 = vsel %vm142_vm6, %v132_v17, %v135_v26 }
  0x1e   :  { %v62_v39 = vsel %vm60_vm8, %v61_v29, %v569_v15  ;;  %v147_v41 = vsel %vm145_vm10, %v135_v26, 2102212464  ;;  %v151_v42 = vsel %vm145_vm10, %v138_v31, 920167782  ;;  %v155_v48 = vsel %vm145_vm10, %v141_v33, 1326507024 }
  0x1f   :  { %v63_v44 = vadd.s32 %v62_v39, %v58_v25  ;;  %v148_v45 = vsel %vm144_vm9, %v132_v17, %v147_v41  ;;  %v152_v47 = vsel %vm144_vm9, %v135_v26, %v151_v42  ;;  %v156_v51 = vsel %vm144_vm9, %v138_v31, %v155_v48 }
  0x20   :  { %v149_v49 = vsel %vm143_vm7, %v146_v35, %v148_v45  ;;  %v153_v50 = vsel %vm143_vm7, %v150_v37, %v152_v47  ;;  %v157_v40 = vsel %vm143_vm7, %v154_v43, %v156_v51  ;;  %v232_v58 = vand.u32 31, %v230_v28 }
  0x21   :  { %v64_v52 = vadd.s32 536870912, %v63_v44  ;;  %v595_v53 = vmul.u32.u64.low %v535_v27, %v153_v50  ;;  %v596_v54 = vmul.u32.u64.high %v535_v27, %v153_v50, %v595_v53  ;;  %v225_v59 = vand.u32 8388607, %v218_v24 }
  0x22   :  { %v600_v55 = vmul.u32.u64.low %v535_v27, %v157_v40  ;;  %v601_v56 = vmul.u32.u64.high %v535_v27, %v157_v40, %v600_v55  ;;  %v165_v27 = vmul.u32 %v535_v27, %v149_v49  ;;  %v233_v63 = vsub.s32 32, %v232_v58 }
  0x23   :  { %v604_v57 = vshrl.u32 %v64_v52, 30  ;;  %v168_v61 = vadd.s32 1, %v596_v54  ;;  %v226_v8 = vor.u32 8388608, %v225_v59  ;;  %v329_v9 = vand.u32 2139095040, %v614_v62 }
  0x24   :  { %vm167_vm12 = vc.u32 %v601_v56, %v595_v53  ;;  %v623_v11 = vshrl.u32 %v230_v28, 5  ;;  %v235_v12 = vshll.u32 %v492_v30, %v232_v58  ;;  %v238_v15 = vshll.u32 %v493_v32, %v232_v58 }
  0x25   :  { %v66_v60 = vshll.u32 %v604_v57, 30  ;;  %v169_v5 = vsel %vm167_vm12, %v168_v61, %v596_v54  ;;  %v236_v17 = vshrl.u32 %v493_v32, %v233_v63  ;;  %v239_v18 = vshrl.u32 %v494_v34, %v233_v63 }
  0x26   :  { %v170_v7 = vadd.s32 %v169_v5, %v165_v27  ;;  %v241_v19 = vshll.u32 %v494_v34, %v232_v58  ;;  %v242_v21 = vshrl.u32 %v495_v36, %v233_v63  ;;  %v244_v22 = vshll.u32 %v495_v36, %v232_v58 }
  0x27   :  { %v618_v3 = vsub.s32 %v63_v44, %v66_v60  ;;  %v245_v23 = vshrl.u32 %v496_v38, %v233_v63  ;;  %v247_v26 = vshll.u32 %v496_v38, %v232_v58  ;;  %v248_v29 = vshrl.u32 %v497_v46, %v233_v63 }
  0x28   :  { %v171_v16 = vadd.s32 536870912, %v170_v7  ;;  %v326_v31 = vand.u32 2147483647, %v614_v62  ;;  %v59_v13 = vadd.s32 %v568_v14, %v565_v13  ;;  %v642_v33 = vshll.u32 %v226_v8, 8 }
  0x29   :  { %v69_v10 = vsub.s32 0, %v618_v3  ;;  %v330_v35 = vshrl.u32 %v329_v9, 23  ;;  %v234_v39 = vshrl.u32 %v492_v30, %v233_v63  ;;  %v237_v41 = vor.u32 %v236_v17, %v235_v12 }
  0x2a   :  { %v634_v25 = vshrl.u32 %v171_v16, 30  ;;  %v240_v42 = vor.u32 %v239_v18, %v238_v15  ;;  %v243_v44 = vor.u32 %v242_v21, %v241_v19  ;;  %v246_v45 = vor.u32 %v245_v23, %v244_v22 }
  0x2b   :  { %v433_v20 = vmin.u32 %v69_v10, %v618_v3  ;;  %vm250_vm14 = vcmp.lt.s32.totalorder %v623_v11, 1  ;;  %v89_v47 = vsub.s32 4, %v604_v57  ;;  %v249_v49 = vor.u32 %v248_v29, %v247_v26 }
  0x2c   :  { %v173_v37 = vshll.u32 %v634_v25, 30  ;;  %vm253_vm15 = vcmp.lt.s32.totalorder %v623_v11, 4  ;;  %vm251_vm2 = vcmp.lt.s32.totalorder %v623_v11, 2  ;;  %vm252_vm3 = vcmp.lt.s32.totalorder %v623_v11, 3 }
  0x2d   :  { %v71_v14 = vclz %v433_v20  ;;  %v255_v50 = vsel %vm253_vm15, %v243_v44, 2102212464  ;;  %v254_v40 = vsel %vm250_vm14, %v234_v39, %v237_v41  ;;  %v258_v54 = vsel %vm250_vm14, %v237_v41, %v240_v42 }
  0x2e   :  { %v648_v48 = vsub.s32 %v170_v7, %v173_v37  ;;  %v259_v27 = vsel %vm253_vm15, %v246_v45, 920167782  ;;  %v256_v60 = vsel %vm252_vm3, %v240_v42, %v255_v50  ;;  %v262_v63 = vsel %vm250_vm14, %v240_v42, %v243_v44 }
  0x2f   :  { %v434_v43 = vadd.s32 4294967294, %v71_v14  ;;  %v260_v61 = vsel %vm252_vm3, %v243_v44, %v259_v27  ;;  %v263_v8 = vsel %vm253_vm15, %v249_v49, 1326507024  ;;  %v90_v57 = vsel %vm5_vm13, %v89_v47, %v604_v57 }
  0x30   :  { %v176_v52 = vsub.s32 0, %v648_v48  ;;  %v261_v7 = vsel %vm251_vm2, %v258_v54, %v260_v61  ;;  %v449_v10 = vadd.s32 4294967169, %v330_v35  ;;  %v685_v12 = vand.u32 8388607, %v326_v31 }
  0x31   :  { %vm435_vm1 = vcmp.lt.s32.totalorder %v434_v43, 0  ;;  %v257_v17 = vsel %vm251_vm2, %v254_v40, %v256_v60  ;;  %v264_v18 = vsel %vm252_vm3, %v246_v45, %v263_v8  ;;  %v166_v53 = vadd.s32 %v595_v53, %v601_v56 }
  0x32   :  { %v74_v51 = vsel %vm435_vm1, 0, %v434_v43  ;;  %v438_v59 = vmin.u32 %v176_v52, %v648_v48  ;;  %v265_v11 = vsel %vm251_vm2, %v262_v63, %v264_v18  ;;  %v336_v56 = vadd.s32 1, %v449_v10 }
  0x33   :  { %v75_v55 = vsub.s32 32, %v74_v51  ;;  %v76_v28 = vshll.u32 %v618_v3, %v74_v51  ;;  %v79_v58 = vsub.s32 4294967266, %v74_v51  ;;  %v196_v37 = vsub.s32 4, %v634_v25 }
  0x34   :  { %v178_v9 = vclz %v438_v59  ;;  %v694_v20 = vmul.u32.u64.low %v642_v33, %v261_v7  ;;  %v695_v21 = vmul.u32.u64.high %v642_v33, %v261_v7, %v694_v20  ;;  %vm337_vm6 = vcmp.gt.s32.totalorder %v336_v56, 0 }
  0x35   :  { %v77_v3 = vshrl.u32 %v59_v13, %v75_v55  ;;  %v80_v5 = vadd.s32 127, %v79_v58  ;;  %v699_v26 = vmul.u32.u64.low %v642_v33, %v265_v11  ;;  %v700_v29 = vmul.u32.u64.high %v642_v33, %v265_v11, %v699_v26 }
  0x36   :  { %v439_v19 = vadd.s32 4294967294, %v178_v9  ;;  %v92_v13 = vsel %vm653_vm0, 0, %v90_v57  ;;  %v273_v33 = vmul.u32 %v642_v33, %v257_v17  ;;  %v276_v43 = vadd.s32 1, %v695_v21 }
  0x37   :  { %v78_v15 = vor.u32 %v77_v3, %v76_v28  ;;  %v81_v16 = vshll.u32 %v80_v5, 23  ;;  %v96_v45 = vadd.s32 3, %v92_v13  ;;  %vm275_vm5 = vc.u32 %v700_v29, %v694_v20 }
  0x38   :  { %vm440_vm4 = vcmp.lt.s32.totalorder %v439_v19, 0  ;;  %v277_v49 = vsel %vm275_vm5, %v276_v43, %v695_v21  ;;  %v338_v50 = vsel %vm337_vm6, %v336_v56, 0  ;;  %vm112_vm7 = vcmp.lt.s32.totalorder %v516_v1, 0 }
  0x39   :  { %v82_v22 = vor.u32 4788187, %v81_v16  ;;  %v85_v23 = vcvt.s32.f32 %v78_v15  ;;  %v181_v35 = vsel %vm440_vm4, 0, %v439_v19  ;;  %v278_v52 = vadd.s32 %v277_v49, %v273_v33 }
  0x3a   :  { %v182_v39 = vsub.s32 32, %v181_v35  ;;  %v183_v41 = vshll.u32 %v648_v48, %v181_v35  ;;  %v186_v42 = vsub.s32 4294967266, %v181_v35  ;;  %v340_v40 = vand.u32 31, %v338_v50 }
  0x3b   :  { %v83_v14 = vand.u32 2147483647, %v82_v22  ;;  %vm716_vm8 = vcmp.le.f32.partialorder %v110_v4, 0.7853982  ;;  %v197_v25 = vsel %vm112_vm7, %v196_v37, %v634_v25  ;;  %v279_v58 = vadd.s32 536870912, %v278_v52 }
  0x3c   :  { %v184_v47 = vshrl.u32 %v166_v53, %v182_v39  ;;  %v187_v48 = vadd.s32 127, %v186_v42  ;;  %v334_v27 = vor.u32 8388608, %v685_v12  ;;  %v341_v59 = vsub.s32 32, %v340_v40 }
  0x3d   :  { %v86_v44 = vmul.f32 %v85_v23, %v83_v14  ;;  %v729_v60 = vand.u32 3, %v96_v45  ;;  %v199_v3 = vsel %vm716_vm8, 0, %v197_v25  ;;  %v733_v5 = vshrl.u32 %v279_v58, 30 }
  0x3e   :  { %v185_v54 = vor.u32 %v184_v47, %v183_v41  ;;  %v188_v55 = vshll.u32 %v187_v48, 23  ;;  %v735_v7 = vshrl.u32 %v338_v50, 5  ;;  %v343_v57 = vshll.u32 %v492_v30, %v340_v40 }
  0x3f   :  { %v87_v51 = vxor.u32 2147483648, %v86_v44  ;;  %v346_v9 = vshll.u32 %v493_v32, %v340_v40  ;;  %v281_v10 = vshll.u32 %v733_v5, 30  ;;  %v344_v32 = vshrl.u32 %v493_v32, %v341_v59 }
  0x40   :  { %v189_v61 = vor.u32 4788187, %v188_v55  ;;  %v192_v63 = vcvt.s32.f32 %v185_v54  ;;  %v347_v12 = vshrl.u32 %v494_v34, %v341_v59  ;;  %v349_v34 = vshll.u32 %v494_v34, %v340_v40 }
  0x41   :  { %v88_v28 = vsel %vm5_vm13, %v87_v51, %v86_v44  ;;  %v350_v16 = vshrl.u32 %v495_v36, %v341_v59  ;;  %v352_v36 = vshll.u32 %v495_v36, %v340_v40  ;;  %v353_v17 = vshrl.u32 %v496_v38, %v341_v59 }
  0x42   :  { %v91_v2 = vsel %vm653_vm0, %v511_v0, %v88_v28  ;;  %v190_v8 = vand.u32 2147483647, %v189_v61  ;;  %vm98_vm9 = vcmp.lt.s32.totalorder %v729_v60, 2  ;;  %vm99_vm10 = vcmp.eq.s32.totalorder %v729_v60, 0 }
  0x43   :  { %476 = vcosq.f32 %v91_v2  ;;  %vm102_vm11 = vcmp.eq.s32.totalorder %v729_v60, 2  ;;  %v749_v18 = vsub.s32 %v278_v52, %v281_v10  ;;  %vm95_vm12 = vweird.f32 %v511_v0 }
  0x44   :  { %478 = vsinq.f32 %v91_v2  ;;  %v193_v15 = vmul.f32 %v192_v63, %v190_v8  ;;  %v354_v11 = vor.u32 %v353_v17, %v352_v36  ;;  %v355_v38 = vshll.u32 %v496_v38, %v340_v40 }
  0x45   :  { %v356_v46 = vshrl.u32 %v497_v46, %v341_v59  ;;  %v203_v21 = vadd.s32 3, %v199_v3  ;;  %v284_v22 = vsub.s32 0, %v749_v18  ;;  %v342_v30 = vshrl.u32 %v492_v30, %v341_v59 }
  0x46   :  { %v194_v19 = vxor.u32 2147483648, %v193_v15  ;;  %v345_v23 = vor.u32 %v344_v32, %v343_v57  ;;  %v348_v13 = vor.u32 %v347_v12, %v346_v9  ;;  %v351_v53 = vor.u32 %v350_v16, %v349_v34 }
  0x47   :  { %vm361_vm13 = vcmp.lt.s32.totalorder %v735_v7, 4  ;;  %v444_v14 = vmin.u32 %v284_v22, %v749_v18  ;;  %vm358_vm14 = vcmp.lt.s32.totalorder %v735_v7, 1  ;;  %vm360_vm15 = vcmp.lt.s32.totalorder %v735_v7, 3 }
  0x48   :  { %v195_v26 = vsel %vm112_vm7, %v194_v19, %v193_v15  ;;  %v357_v35 = vor.u32 %v356_v46, %v355_v38  ;;  %v363_v37 = vsel %vm361_vm13, %v351_v53, 2102212464  ;;  %v367_v33 = vsel %vm361_vm13, %v354_v11, 920167782 }
  0x49   :  { %v198_v56 = vsel %vm716_vm8, %v516_v1, %v195_v26  ;;  %v204_v41 = vand.u32 3, %v203_v21  ;;  %v286_v42 = vclz %v444_v14  ;;  %v374_v43 = vshll.u32 %v334_v27, 8 }
  0x4a   :  { %480 = vcosq.f32 %v198_v56  ;;  %vm359_vm0 = vcmp.lt.s32.totalorder %v735_v7, 2  ;;  %v366_v47 = vsel %vm358_vm14, %v345_v23, %v348_v13  ;;  %v368_v48 = vsel %vm360_vm15, %v351_v53, %v367_v33 }
  0x4b   :  { %482 = vsinq.f32 %v198_v56  ;;  %v445_v50 = vadd.s32 4294967294, %v286_v42  ;;  %v362_v51 = vsel %vm358_vm14, %v342_v30, %v345_v23  ;;  %v364_v52 = vsel %vm360_vm15, %v348_v13, %v363_v37 }
  0x4c   :  { %v274_v20 = vadd.s32 %v694_v20, %v700_v29  ;;  %v370_v29 = vsel %vm358_vm14, %v348_v13, %v351_v53  ;;  %v371_v4 = vsel %vm361_vm13, %v357_v35, 1326507024  ;;  %v369_v55 = vsel %vm359_vm0, %v366_v47, %v368_v48 }
  0x4d   :  { %v477_v39 = vpop.eup %476  ;;  %vm446_vm1 = vcmp.lt.s32.totalorder %v445_v50, 0  ;;  %v372_v25 = vsel %vm360_vm15, %v354_v11, %v371_v4  ;;  %v365_v27 = vsel %vm359_vm0, %v362_v51, %v364_v52  ;;  %vm206_vm2 = vcmp.eq.s32.totalorder %v204_v41, 0 }
  0x4e   :  { %v479_v44 = vpop.eup %478  ;;  %v103_v45 = vxor.u32 2147483648, %v477_v39  ;;  %v289_v58 = vsel %vm446_vm1, 0, %v445_v50  ;;  %v373_v59 = vsel %vm359_vm0, %v370_v29, %v372_v25  ;;  %vm209_vm3 = vcmp.eq.s32.totalorder %v204_v41, 2 }
  0x4f   :  { %v100_v49 = vxor.u32 2147483648, %v479_v44  ;;  %v290_v2 = vsub.s32 32, %v289_v58  ;;  %v291_v60 = vshll.u32 %v749_v18, %v289_v58  ;;  %v294_v61 = vsub.s32 4294967266, %v289_v58 }
  0x50   :  { %v104_v40 = vsel %vm102_vm11, %v103_v45, %v479_v44  ;;  %v804_v63 = vmul.u32.u64.low %v374_v43, %v373_v59  ;;  %v805_v3 = vmul.u32.u64.high %v374_v43, %v373_v59, %v804_v63  ;;  %v381_v16 = vmul.u32 %v374_v43, %v365_v27 }
  0x51   :  { %v101_v54 = vsel %vm99_vm10, %v477_v39, %v100_v49  ;;  %v807_v7 = vmul.u32.u64.low %v374_v43, %v369_v55  ;;  %v808_v8 = vmul.u32.u64.high %v374_v43, %v369_v55, %v807_v7  ;;  %v292_v57 = vshrl.u32 %v274_v20, %v290_v2 }
  0x52   :  { %v105_v28 = vsel %vm98_vm9, %v101_v54, %v104_v40  ;;  %v295_v9 = vadd.s32 127, %v294_v61  ;;  %vm205_vm4 = vcmp.lt.s32.totalorder %v204_v41, 2  ;;  %vm202_vm6 = vweird.f32 %v516_v1 }
  0x53   :  { %v106_v0 = vsel %vm95_vm12, nan, %v105_v28  ;;  %v293_v34 = vor.u32 %v292_v57, %v291_v60  ;;  %vm383_vm5 = vc.u32 %v805_v3, %v807_v7  ;;  %v384_v17 = vadd.s32 1, %v808_v8 }
  0x54   :  { %107 = vst [vmem:[%s838_s1] sm:$0xff] %v106_v0  ;;  %v481_v10 = vpop.eup %480  ;;  %v296_v15 = vshll.u32 %v295_v9, 23  ;;  %v304_v22 = vsub.s32 4, %v733_v5  ;;  %vm220_vm7 = vcmp.lt.s32.totalorder %v525_v6, 0  ;;  %vm219_vm8 = vcmp.le.f32.partialorder %v218_v24, 0.7853982 }
  0x55   :  { %v483_v32 = vpop.eup %482  ;;  %v210_v12 = vxor.u32 2147483648, %v481_v10  ;;  %v300_v19 = vcvt.s32.f32 %v293_v34  ;;  %v385_v38 = vsel %vm383_vm5, %v384_v17, %v808_v8  ;;  %v382_v48 = vadd.s32 %v807_v7, %v805_v3 }
  0x56   :  { %v207_v36 = vxor.u32 2147483648, %v483_v32  ;;  %v297_v18 = vor.u32 4788187, %v296_v15  ;;  %v386_v30 = vadd.s32 %v385_v38, %v381_v16  ;;  %v305_v5 = vsel %vm220_vm7, %v304_v22, %v733_v5 }
  0x57   :  { %v211_v1 = vsel %vm209_vm3, %v210_v12, %v483_v32  ;;  %v307_v37 = vsel %vm219_vm8, 0, %v305_v5  ;;  %vm310_vm13 = vweird.f32 %v525_v6  ;;  %vm328_vm14 = vcmp.lt.s32.totalorder %v614_v62, 0 }
  0x58   :  { %v208_v11 = vsel %vm206_vm2, %v481_v10, %v207_v36  ;;  %v298_v21 = vand.u32 2147483647, %v297_v18  ;;  %v387_v13 = vadd.s32 536870912, %v386_v30  ;;  %v311_v39 = vadd.s32 3, %v307_v37 }
  0x59   :  { %v212_v46 = vsel %vm205_vm4, %v208_v11, %v211_v1  ;;  %vm327_vm15 = vcmp.le.f32.partialorder %v326_v31, 0.7853982  ;;  %vm418_vm3 = vweird.f32 %v614_v62 }
  0x5a   :  { %v213_v23 = vsel %vm202_vm6, nan, %v212_v46  ;;  %v301_v26 = vmul.f32 %v300_v19, %v298_v21  ;;  %v388_v53 = vshrl.u32 %v387_v13, 30  ;;  %v312_v43 = vand.u32 3, %v311_v39 }
  0x5b   :  { %441 = vst [vmem:[%s838_s1 + $0x10] sm:$0xff] %v213_v23 }
  0x5c   :  { %v302_v24 = vxor.u32 2147483648, %v301_v26  ;;  %v389_v14 = vshll.u32 %v388_v53, 30  ;;  %vm317_vm9 = vcmp.eq.s32.totalorder %v312_v43, 2  ;;  %vm313_vm11 = vcmp.lt.s32.totalorder %v312_v43, 2 }
  0x5d   :  { %vm314_vm12 = vcmp.eq.s32.totalorder %v312_v43, 0  ;;  %v412_v60 = vsub.s32 4, %v388_v53 }
  0x5e   :  { %v303_v56 = vsel %vm220_vm7, %v302_v24, %v301_v26  ;;  %v390_v33 = vsub.s32 %v386_v30, %v389_v14 }
  0x5f   :  { %v306_v35 = vsel %vm219_vm8, %v525_v6, %v303_v56  ;;  %v413_v63 = vsel %vm328_vm14, %v412_v60, %v388_v53 }
  0x60   :  { %484 = vcosq.f32 %v306_v35  ;;  %v392_v41 = vsub.s32 0, %v390_v33  ;;  %v415_v8 = vsel %vm327_vm15, 0, %v413_v63 }
  0x61   :  { %486 = vsinq.f32 %v306_v35  ;;  %v419_v57 = vadd.s32 3, %v415_v8 }
  0x62   :  { %v450_v42 = vmin.u32 %v392_v41, %v390_v33 }
  0x63   :  { %v420_v9 = vand.u32 3, %v419_v57 }
  0x64   :  { %v394_v44 = vclz %v450_v42 }
  0x65   :  { %vm425_vm0 = vcmp.eq.s32.totalorder %v420_v9, 2  ;;  %vm422_vm1 = vcmp.eq.s32.totalorder %v420_v9, 0  ;;  %vm421_vm2 = vcmp.lt.s32.totalorder %v420_v9, 2 }
  0x66   :  { %v451_v45 = vadd.s32 4294967294, %v394_v44 }
  0x68   :  { %vm452_vm10 = vcmp.lt.s32.totalorder %v451_v45, 0 }
  0x69   :  { %v397_v51 = vsel %vm452_vm10, 0, %v451_v45 }
  0x6a   :  { %v485_v47 = vpop.eup %484  ;;  %v398_v40 = vsub.s32 32, %v397_v51  ;;  %v399_v20 = vshll.u32 %v390_v33, %v397_v51  ;;  %v402_v29 = vsub.s32 4294967266, %v397_v51 }
  0x6b   :  { %v487_v49 = vpop.eup %486  ;;  %v318_v50 = vxor.u32 2147483648, %v485_v47 }
  0x6c   :  { %v315_v52 = vxor.u32 2147483648, %v487_v49  ;;  %v400_v54 = vshrl.u32 %v382_v48, %v398_v40  ;;  %v403_v55 = vadd.s32 127, %v402_v29 }
  0x6d   :  { %v319_v6 = vsel %vm317_vm9, %v318_v50, %v487_v49 }
  0x6e   :  { %v316_v4 = vsel %vm314_vm12, %v485_v47, %v315_v52  ;;  %v401_v58 = vor.u32 %v400_v54, %v399_v20  ;;  %v404_v27 = vshll.u32 %v403_v55, 23 }
  0x6f   :  { %v320_v25 = vsel %vm313_vm11, %v316_v4, %v319_v6 }
  0x70   :  { %v321_v28 = vsel %vm310_vm13, nan, %v320_v25  ;;  %v405_v59 = vor.u32 4788187, %v404_v27  ;;  %v408_v0 = vcvt.s32.f32 %v401_v58 }
  0x71   :  { %447 = vst [vmem:[%s838_s1 + $0x8] sm:$0xff] %v321_v28 }
  0x72   :  { %v406_v2 = vand.u32 2147483647, %v405_v59 }
  0x74   :  { %v409_v61 = vmul.f32 %v408_v0, %v406_v2 }
  0x76   :  { %v410_v31 = vxor.u32 2147483648, %v409_v61 }
  0x78   :  { %v411_v3 = vsel %vm328_vm14, %v410_v31, %v409_v61 }
  0x79   :  { %v414_v7 = vsel %vm327_vm15, %v614_v62, %v411_v3 }
  0x7a   :  { %488 = vcosq.f32 %v414_v7 }
  0x7b   :  { %490 = vsinq.f32 %v414_v7 }
  0x84   :  { %v489_v10 = vpop.eup %488 }
  0x85   :  { %v491_v32 = vpop.eup %490  ;;  %v426_v12 = vxor.u32 2147483648, %v489_v10 }
  0x86   :  { %v423_v34 = vxor.u32 2147483648, %v491_v32 }
  0x87   :  { %v427_v62 = vsel %vm425_vm0, %v426_v12, %v491_v32 }
  0x88   :  { %v424_v15 = vsel %vm422_vm1, %v489_v10, %v423_v34 }
  0x89   :  { %v428_v16 = vsel %vm421_vm2, %v424_v15, %v427_v62 }
  0x8a   :  { %v429_v36 = vsel %vm418_vm3, nan, %v428_v16 }
  0x8b   :  { %453 = vst [vmem:[%s838_s1 + $0x18] sm:$0xff] %v429_v36 }

// kernel: sin.6
= control target key start
LH: loop header
LB: loop body
LE: loop exit
PB: predicated region body
PF: predicated region fallthrough
CT: control target
= control target key end

     0   :  { %v248_v21 = vmov 683565275   ;;  %v249_v23 = vmov 2475754826   ;;  %v250_v25 = vmov 2131351028   ;;  %s352_s0 = inlined_call_operand.vmem [shape: f32[2,8,1], index: 0, kind: input, shape index: {}]   ;;  %s353_s1 = inlined_call_operand.vmem [shape: f32[2,8,1], index: 1, kind: output, shape index: {}]  }
   0x1   :  { %v267_v0 = vld [vmem:[%s352_s0] sm:$0x1]  ;;  %v274_v3 = vld [vmem:[%s352_s0 + $0x1] sm:$0x1]  ;;  %v251_v27 = vmov 2102212464  }
   0x2   :  { %v3_v1 = vand.u32 2147483647, %v267_v0  ;;  %v6_v2 = vand.u32 2139095040, %v267_v0  ;;  %v110_v6 = vand.u32 2147483647, %v274_v3  ;;  %v113_v7 = vand.u32 2139095040, %v274_v3 }
   0x3   :  { %v252_v29 = vmov 920167782   ;;  %v253_v36 = vmov 1326507024   ;;  %vm5_vm14 = vcmp.lt.s32.totalorder %v267_v0, 0 }
   0x4   :  { %v7_v4 = vshrl.u32 %v6_v2, 23  ;;  %v10_v5 = vand.u32 8388607, %v3_v1  ;;  %v114_v9 = vshrl.u32 %v113_v7, 23  ;;  %v282_v13 = vand.u32 8388607, %v110_v6 }
   0x5   :  { %vm4_vm15 = vcmp.le.f32.partialorder %v3_v1, 0.7853982 }
   0x6   :  { %v216_v8 = vadd.s32 4294967169, %v7_v4  ;;  %v11_v11 = vor.u32 8388608, %v10_v5  ;;  %v221_v12 = vadd.s32 4294967169, %v114_v9  ;;  %v118_v19 = vor.u32 8388608, %v282_v13 }
   0x8   :  { %v13_v10 = vadd.s32 1, %v216_v8  ;;  %v120_v15 = vadd.s32 1, %v221_v12  ;;  %v284_v18 = vshll.u32 %v11_v11, 8  ;;  %v158_v13 = vshll.u32 %v118_v19, 8 }
   0xa   :  { %vm14_vm0 = vcmp.gt.s32.totalorder %v13_v10, 0  ;;  %vm121_vm1 = vcmp.gt.s32.totalorder %v120_v15, 0 }
   0xb   :  { %v15_v14 = vsel %vm14_vm0, %v13_v10, 0  ;;  %v122_v41 = vsel %vm121_vm1, %v120_v15, 0  ;;  %vm112_vm0 = vcmp.lt.s32.totalorder %v274_v3, 0  ;;  %vm335_vm1 = vcmp.le.f32.partialorder %v110_v6, 0.7853982 }
   0xc   :  { %v16_v16 = vshrl.u32 %v15_v14, 5  ;;  %v17_v17 = vand.u32 31, %v15_v14  ;;  %v123_v44 = vshrl.u32 %v122_v41, 5  ;;  %v124_v45 = vand.u32 31, %v122_v41 }
   0xe   :  { %v18_v20 = vsub.s32 32, %v17_v17  ;;  %v20_v22 = vshll.u32 %v248_v21, %v17_v17  ;;  %v23_v24 = vshll.u32 %v249_v23, %v17_v17  ;;  %v26_v26 = vshll.u32 %v250_v25, %v17_v17 }
   0xf   :  { %v29_v28 = vshll.u32 %v251_v27, %v17_v17  ;;  %v32_v30 = vshll.u32 %v252_v29, %v17_v17  ;;  %vm35_vm2 = vcmp.lt.s32.totalorder %v16_v16, 1  ;;  %vm36_vm3 = vcmp.lt.s32.totalorder %v16_v16, 2 }
  0x10   :  { %v19_v31 = vshrl.u32 %v248_v21, %v18_v20  ;;  %v21_v32 = vshrl.u32 %v249_v23, %v18_v20  ;;  %v24_v33 = vshrl.u32 %v250_v25, %v18_v20  ;;  %v27_v34 = vshrl.u32 %v251_v27, %v18_v20 }
  0x11   :  { %v30_v35 = vshrl.u32 %v252_v29, %v18_v20  ;;  %v33_v37 = vshrl.u32 %v253_v36, %v18_v20  ;;  %vm37_vm4 = vcmp.lt.s32.totalorder %v16_v16, 3  ;;  %vm38_vm5 = vcmp.lt.s32.totalorder %v16_v16, 4 }
  0x12   :  { %v22_v38 = vor.u32 %v21_v32, %v20_v22  ;;  %v25_v39 = vor.u32 %v24_v33, %v23_v24  ;;  %v28_v40 = vor.u32 %v27_v34, %v26_v26  ;;  %v125_v53 = vsub.s32 32, %v124_v45 }
  0x13   :  { %v31_v42 = vor.u32 %v30_v35, %v29_v28  ;;  %v34_v43 = vor.u32 %v33_v37, %v32_v30  ;;  %v127_v57 = vshll.u32 %v248_v21, %v124_v45  ;;  %v130_v7 = vshll.u32 %v249_v23, %v124_v45 }
  0x14   :  { %v39_v46 = vsel %vm35_vm2, %v19_v31, %v22_v38  ;;  %v40_v47 = vsel %vm38_vm5, %v28_v40, 2102212464  ;;  %v43_v48 = vsel %vm35_vm2, %v22_v38, %v25_v39  ;;  %v47_v49 = vsel %vm35_vm2, %v25_v39, %v28_v40 }
  0x15   :  { %v41_v50 = vsel %vm37_vm4, %v25_v39, %v40_v47  ;;  %v44_v51 = vsel %vm38_vm5, %v31_v42, 920167782  ;;  %v48_v52 = vsel %vm38_vm5, %v34_v43, 1326507024  ;;  %v126_v61 = vshrl.u32 %v248_v21, %v125_v53 }
  0x16   :  { %v42_v54 = vsel %vm36_vm3, %v39_v46, %v41_v50  ;;  %v45_v55 = vsel %vm37_vm4, %v28_v40, %v44_v51  ;;  %v49_v56 = vsel %vm37_vm4, %v31_v42, %v48_v52  ;;  %v128_v5 = vshrl.u32 %v249_v23, %v125_v53 }
  0x17   :  { %v46_v58 = vsel %vm36_vm3, %v43_v48, %v45_v55  ;;  %v50_v59 = vsel %vm36_vm3, %v47_v49, %v49_v56  ;;  %v58_v60 = vmul.u32 %v284_v18, %v42_v54  ;;  %v131_v8 = vshrl.u32 %v250_v25, %v125_v53 }
  0x18   :  { %v299_v62 = vmul.u32.u64.low %v284_v18, %v50_v59  ;;  %v300_v63 = vmul.u32.u64.high %v284_v18, %v50_v59, %v299_v62  ;;  %v303_v2 = vmul.u32.u64.low %v284_v18, %v46_v58  ;;  %v304_v4 = vmul.u32.u64.high %v284_v18, %v46_v58, %v303_v2 }
  0x19   :  { %v133_v9 = vshll.u32 %v250_v25, %v124_v45  ;;  %v134_v10 = vshrl.u32 %v251_v27, %v125_v53  ;;  %v136_v11 = vshll.u32 %v251_v27, %v124_v45  ;;  %v137_v12 = vshrl.u32 %v252_v29, %v125_v53 }
  0x1a   :  { %v139_v14 = vshll.u32 %v252_v29, %v124_v45  ;;  %v129_v15 = vor.u32 %v128_v5, %v127_v57  ;;  %v132_v16 = vor.u32 %v131_v8, %v130_v7  ;;  %v140_v17 = vshrl.u32 %v253_v36, %v125_v53 }
  0x1b   :  { %vm142_vm6 = vcmp.lt.s32.totalorder %v123_v44, 1  ;;  %vm60_vm7 = vc.u32 %v300_v63, %v303_v2  ;;  %v61_v18 = vadd.s32 1, %v304_v4  ;;  %v135_v20 = vor.u32 %v134_v10, %v133_v9 }
  0x1c   :  { %v138_v19 = vor.u32 %v137_v12, %v136_v11  ;;  %v141_v21 = vor.u32 %v140_v17, %v139_v14  ;;  %vm143_vm8 = vcmp.lt.s32.totalorder %v123_v44, 2  ;;  %vm144_vm9 = vcmp.lt.s32.totalorder %v123_v44, 3 }
  0x1d   :  { %v62_v22 = vsel %vm60_vm7, %v61_v18, %v304_v4  ;;  %vm145_vm10 = vcmp.lt.s32.totalorder %v123_v44, 4  ;;  %v146_v23 = vsel %vm142_vm6, %v126_v61, %v129_v15  ;;  %v150_v24 = vsel %vm142_vm6, %v129_v15, %v132_v16 }
  0x1e   :  { %v63_v25 = vadd.s32 %v62_v22, %v58_v60  ;;  %v147_v26 = vsel %vm145_vm10, %v135_v20, 2102212464  ;;  %v151_v27 = vsel %vm145_vm10, %v138_v19, 920167782  ;;  %v154_v28 = vsel %vm142_vm6, %v132_v16, %v135_v20 }
  0x1f   :  { %v148_v29 = vsel %vm144_vm9, %v132_v16, %v147_v26  ;;  %v152_v30 = vsel %vm144_vm9, %v135_v20, %v151_v27  ;;  %v155_v31 = vsel %vm145_vm10, %v141_v21, 1326507024  ;;  %v59_v55 = vadd.s32 %v303_v2, %v300_v63 }
  0x20   :  { %v64_v32 = vadd.s32 536870912, %v63_v25  ;;  %v153_v33 = vsel %vm143_vm8, %v150_v24, %v152_v30  ;;  %v156_v34 = vsel %vm144_vm9, %v138_v19, %v155_v31  ;;  %v149_v35 = vsel %vm143_vm8, %v146_v23, %v148_v29 }
  0x21   :  { %v157_v36 = vsel %vm143_vm8, %v154_v28, %v156_v34  ;;  %v317_v37 = vmul.u32.u64.low %v158_v13, %v153_v33  ;;  %v318_v38 = vmul.u32.u64.high %v158_v13, %v153_v33, %v317_v37  ;;  %v165_v43 = vmul.u32 %v158_v13, %v149_v35 }
  0x22   :  { %v65_v39 = vshrl.u32 %v64_v32, 30  ;;  %v320_v40 = vmul.u32.u64.low %v158_v13, %v157_v36  ;;  %v321_v41 = vmul.u32.u64.high %v158_v13, %v157_v36, %v320_v40  ;;  %vm95_vm5 = vweird.f32 %v267_v0 }
  0x23   :  { %v168_v44 = vadd.s32 1, %v318_v38  ;;  %vm202_vm9 = vweird.f32 %v274_v3 }
  0x24   :  { %v66_v42 = vshll.u32 %v65_v39, 30  ;;  %vm167_vm11 = vc.u32 %v321_v41, %v317_v37  ;;  %v89_v12 = vsub.s32 4, %v65_v39  ;;  %v166_v14 = vadd.s32 %v317_v37, %v321_v41 }
  0x25   :  { %v169_v46 = vsel %vm167_vm11, %v168_v44, %v318_v38 }
  0x26   :  { %v67_v45 = vsub.s32 %v63_v25, %v66_v42  ;;  %v170_v48 = vadd.s32 %v169_v46, %v165_v43  ;;  %v90_v13 = vsel %vm5_vm14, %v89_v12, %v65_v39 }
  0x27   :  { %v92_v24 = vsel %vm4_vm15, 0, %v90_v13 }
  0x28   :  { %v69_v47 = vsub.s32 0, %v67_v45  ;;  %v171_v50 = vadd.s32 536870912, %v170_v48  ;;  %v96_v29 = vadd.s32 3, %v92_v24 }
  0x2a   :  { %v217_v49 = vmin.u32 %v69_v47, %v67_v45  ;;  %v172_v52 = vshrl.u32 %v171_v50, 30  ;;  %v97_v33 = vand.u32 3, %v96_v29 }
  0x2c   :  { %v71_v51 = vclz %v217_v49  ;;  %v173_v54 = vshll.u32 %v172_v52, 30  ;;  %v196_v31 = vsub.s32 4, %v172_v52  ;;  %vm102_vm2 = vcmp.eq.s32.totalorder %v97_v33, 2 }
  0x2d   :  { %vm99_vm3 = vcmp.eq.s32.totalorder %v97_v33, 0  ;;  %vm98_vm4 = vcmp.lt.s32.totalorder %v97_v33, 2 }
  0x2e   :  { %v218_v53 = vadd.s32 4294967294, %v71_v51  ;;  %v174_v57 = vsub.s32 %v170_v48, %v173_v54  ;;  %v197_v35 = vsel %vm112_vm0, %v196_v31, %v172_v52 }
  0x2f   :  { %v199_v39 = vsel %vm335_vm1, 0, %v197_v35 }
  0x30   :  { %vm219_vm12 = vcmp.lt.s32.totalorder %v218_v53, 0  ;;  %v176_v61 = vsub.s32 0, %v174_v57  ;;  %v203_v43 = vadd.s32 3, %v199_v39 }
  0x31   :  { %v74_v56 = vsel %vm219_vm12, 0, %v218_v53 }
  0x32   :  { %v75_v58 = vsub.s32 32, %v74_v56  ;;  %v76_v59 = vshll.u32 %v67_v45, %v74_v56  ;;  %v79_v60 = vsub.s32 4294967266, %v74_v56  ;;  %v222_v2 = vmin.u32 %v176_v61, %v174_v57 }
  0x33   :  { %v204_v47 = vand.u32 3, %v203_v43 }
  0x34   :  { %v77_v62 = vshrl.u32 %v59_v55, %v75_v58  ;;  %v80_v63 = vadd.s32 127, %v79_v60  ;;  %v178_v7 = vclz %v222_v2 }
  0x35   :  { %vm209_vm6 = vcmp.eq.s32.totalorder %v204_v47, 2  ;;  %vm206_vm7 = vcmp.eq.s32.totalorder %v204_v47, 0  ;;  %vm205_vm8 = vcmp.lt.s32.totalorder %v204_v47, 2 }
  0x36   :  { %v78_v4 = vor.u32 %v77_v62, %v76_v59  ;;  %v81_v5 = vshll.u32 %v80_v63, 23  ;;  %v223_v10 = vadd.s32 4294967294, %v178_v7 }
  0x38   :  { %v82_v8 = vor.u32 4788187, %v81_v5  ;;  %v85_v9 = vcvt.s32.f32 %v78_v4  ;;  %vm224_vm13 = vcmp.lt.s32.totalorder %v223_v10, 0 }
  0x39   :  { %v181_v16 = vsel %vm224_vm13, 0, %v223_v10 }
  0x3a   :  { %v83_v11 = vand.u32 2147483647, %v82_v8  ;;  %v182_v17 = vsub.s32 32, %v181_v16  ;;  %v183_v18 = vshll.u32 %v174_v57, %v181_v16  ;;  %v186_v20 = vsub.s32 4294967266, %v181_v16 }
  0x3c   :  { %v86_v15 = vmul.f32 %v85_v9, %v83_v11  ;;  %v184_v19 = vshrl.u32 %v166_v14, %v182_v17  ;;  %v187_v21 = vadd.s32 127, %v186_v20 }
  0x3e   :  { %v87_v1 = vxor.u32 2147483648, %v86_v15  ;;  %v185_v25 = vor.u32 %v184_v19, %v183_v18  ;;  %v188_v26 = vshll.u32 %v187_v21, 23 }
  0x40   :  { %v88_v22 = vsel %vm5_vm14, %v87_v1, %v86_v15  ;;  %v189_v27 = vor.u32 4788187, %v188_v26  ;;  %v192_v28 = vcvt.s32.f32 %v185_v25 }
  0x41   :  { %v91_v23 = vsel %vm4_vm15, %v267_v0, %v88_v22 }
  0x42   :  { %240 = vcosq.f32 %v91_v23  ;;  %v190_v30 = vand.u32 2147483647, %v189_v27 }
  0x43   :  { %242 = vsinq.f32 %v91_v23 }
  0x44   :  { %v193_v32 = vmul.f32 %v192_v28, %v190_v30 }
  0x46   :  { %v194_v34 = vxor.u32 2147483648, %v193_v32 }
  0x48   :  { %v195_v36 = vsel %vm112_vm0, %v194_v34, %v193_v32 }
  0x49   :  { %v198_v38 = vsel %vm335_vm1, %v274_v3, %v195_v36 }
  0x4a   :  { %244 = vcosq.f32 %v198_v38 }
  0x4b   :  { %246 = vsinq.f32 %v198_v38 }
  0x4c   :  { %v241_v37 = vpop.eup %240 }
  0x4d   :  { %v243_v40 = vpop.eup %242  ;;  %v103_v41 = vxor.u32 2147483648, %v241_v37 }
  0x4e   :  { %v100_v42 = vxor.u32 2147483648, %v243_v40 }
  0x4f   :  { %v104_v0 = vsel %vm102_vm2, %v103_v41, %v243_v40 }
  0x50   :  { %v101_v44 = vsel %vm99_vm3, %v241_v37, %v100_v42 }
  0x51   :  { %v105_v45 = vsel %vm98_vm4, %v101_v44, %v104_v0 }
  0x52   :  { %v106_v46 = vsel %vm95_vm5, nan, %v105_v45 }
  0x53   :  { %107 = vst [vmem:[%s353_s1] sm:$0x1] %v106_v46 }
  0x54   :  { %v245_v48 = vpop.eup %244 }
  0x55   :  { %v247_v49 = vpop.eup %246  ;;  %v210_v50 = vxor.u32 2147483648, %v245_v48 }
  0x56   :  { %v207_v51 = vxor.u32 2147483648, %v247_v49 }
  0x57   :  { %v211_v3 = vsel %vm209_vm6, %v210_v50, %v247_v49 }
  0x58   :  { %v208_v52 = vsel %vm206_vm7, %v245_v48, %v207_v51 }
  0x59   :  { %v212_v53 = vsel %vm205_vm8, %v208_v52, %v211_v3 }
  0x5a   :  { %v213_v54 = vsel %vm202_vm9, nan, %v212_v53 }
  0x5b   :  { %225 = vst [vmem:[%s353_s1 + $0x1] sm:$0x1] %v213_v54 }

// kernel: _cost_matrices.1
= control target key start
LH: loop header
LB: loop body
LE: loop exit
PB: predicated region body
PF: predicated region fallthrough
CT: control target
= control target key end

     0   :  { %s575_s9 = smov 0   ;;  %s577_s10 = smov 0   ;;  %s640_s0 = inlined_call_operand.vmem [shape: f32[2,2,8,8], index: 0, kind: input, shape index: {}]   ;;  %s641_s1 = inlined_call_operand.vmem [shape: f32[2,8,128], index: 1, kind: input, shape index: {}]   ;;  %s642_s2 = inlined_call_operand.vmem [shape: f32[2,2,8,128], index: 2, kind: output, shape index: {}]  }
   0x1   :  { %s579_s11 = smov 0   ;;  %s581_s12 = smov 0  }
   0x2   :  { %s583_s13 = smov 0  }
   0x3 LB: > { %s21_s14 = sadd.s32 1, %s540_s11  ;;  %s24_s15 = sadd.s32 1, %s544_s12  ;;  %s548_s13 = sphi %s583_s13, %s12_s13   ;;  %s544_s12 = sphi %s581_s12, %s646_s12   ;;  %s540_s11 = sphi %s579_s11, %s645_s11   ;;  %s536_s10 = sphi %s577_s10, %s644_s10   ;;  %s532_s9 = sphi %s575_s9, %s643_s9  }
   0x4   : > { %p22_p0 = scmp.ge.s32.totalorder %s21_s14, 2  ;;  %p433_p1 = scmp.ge.s32.totalorder %s548_s13, 1 }
   0x5   : > { %p140_p2 = scmp.lt.s32.totalorder %s548_s13, 5 }
   0x6   : > { %s648_s14 = smov (%p22_p0, %s21_s14), 0  ;;  %s650_s15 = smov (!%p22_p0, %s24_s15), %s544_s12 }
   0x7   : > { %p141_p3 = pnand %p433_p1, %p140_p2  ;;  %p26_p4 = scmp.ge.s32.totalorder %s650_s15, 2 }
   0x8   : > { %p172_p5 = scmp.lt.s32.totalorder (!%p141_p3), %s532_s9, 1  ;;  %p174_p6 = scmp.lt.s32.totalorder (!%p141_p3), %s536_s10, 1  ;;  %v550_v0 = vmov (!%p141_p3), 7   ;;  %v551_v1 = vmov (!%p141_p3), 5   ;;  %v553_v3 = vmov (!%p141_p3), 4   ;;  %v554_v4 = vmov (!%p141_p3), 0  }
   0x9   : > { %s652_s15 = smov (%p26_p4, %s650_s15), 0  ;;  %144 = sbr.rel (%p141_p3) target bundleno = 412 (0x19c), region = 28 }
   0xa   : > { %491 = vset.pattern.permute.xlu1 (!%p141_p3), %v550_v0  ;;  %493 = vset.pattern.permute.xlu0 (!%p141_p3), %v551_v1  ;;  %s552_s22 = smov (!%p141_p3), 2   ;;  %v555_v5 = vmov (!%p141_p3), 1   ;;  %v556_v6 = vmov (!%p141_p3), 3   ;;  %v557_v7 = vmov (!%p141_p3), 6   ;;  %s558_s23 = smov (!%p141_p3), 127   ;;  %v559_v10 = vmov (!%p141_p3), 2  }
   0xb   : > { %v199_v13 = vlaneseq (!%p141_p3) }
   0xd   : > { %v200_v15 = vshrl.u32 (!%p141_p3), %v199_v13, 7 }
   0xf   : > { %v273_v17 = vsub.s32 (!%p141_p3), 7, %v200_v15  ;;  %v286_v24 = vsub.s32 (!%p141_p3), 4, %v200_v15  ;;  %v300_v25 = vsub.s32 (!%p141_p3), 5, %v200_v15  ;;  %v315_v30 = vsub.s32 (!%p141_p3), 6, %v200_v15 }
  0x10   : > { %s654_s9 = smov (!%p172_p5, %s532_s9), 1  ;;  %s656_s10 = smov (!%p174_p6, %s536_s10), 1  ;;  %v201_v40 = vsub.s32 0, %v200_v15  ;;  %v210_v41 = vsub.s32 1, %v200_v15  ;;  %v228_v42 = vsub.s32 3, %v200_v15  ;;  %v219_v43 = vsub.s32 2, %v200_v15 }
  0x11   : > { %s434_s16 = sshll.u32 %s654_s9, 1  ;;  %s436_s24 = sshll.u32 %s656_s10, 3 }
  0x12   : > { %s608_s17 = sadd.s32 %s434_s16, %s656_s10  ;;  %s183_s27 = scalar_lea.vmem %s641_s1, %s436_s24 }
  0x13   : > { %s435_s18 = sshll.u32 %s608_s17, 3  ;;  %v193_v18 = vld [vmem:[%s183_s27] sm:$0xff] }
  0x14   : > { %s179_s21 = scalar_lea.vmem %s640_s0, %s435_s18  ;;  %v274_v19 = vrot.slane %v193_v18, %v273_v17  ;;  %v287_v27 = vrot.slane %v193_v18, %v286_v24  ;;  %v301_v29 = vrot.slane %v193_v18, %v300_v25  ;;  %v316_v34 = vrot.slane %v193_v18, %v315_v30  ;;  %s191_s30 = scalar_lea.vmem %s642_s2, %s435_s18 }
  0x15   : > { %v192_v2 = vld [vmem:[%s179_s21] sm:$0xff]  ;;  %v246_v39 = vrot.slane %v193_v18, 6  ;;  %v202_v49 = vrot.slane %v193_v18, %v201_v40  ;;  %v211_v50 = vrot.slane %v193_v18, %v210_v41  ;;  %v229_v51 = vrot.slane %v193_v18, %v228_v42 }
  0x16   : > { %236 = vrot.lane.b32.xlu0 %v192_v2, %s552_s22  ;;  %268 = vperm.xlu1 %491, %v192_v2   ;;  %v220_v52 = vrot.slane %v193_v18, %v219_v43 }
  0x17   : > { %v248_v48 = vsub.f32 %v193_v18, %v246_v39 }
  0x19   : > { %v250_v57 = vrot.slane %v248_v48, 1 }
  0x1a   : > { %492 = vset.pattern.permute.xlu1 %v553_v3 }
  0x1b   : > { %281 = vperm.xlu1 %492, %v192_v2   ;;  %v252_v3 = vmul.f32 %v250_v57, %v248_v48 }
  0x1f   : > { %494 = vset.pattern.permute.xlu1 %v554_v4 }
  0x20   : > { %196 = vperm.xlu1 %494, %v192_v2  }
  0x24   : > { %495 = vset.pattern.permute.xlu1 %v555_v5 }
  0x25   : > { %205 = vperm.xlu1 %495, %v192_v2  }
  0x29   : > { %497 = vset.pattern.permute.xlu1 %v556_v6 }
  0x2a   : > { %223 = vperm.xlu1 %497, %v192_v2  }
  0x2e   : > { %498 = vset.pattern.permute.xlu1 %v557_v7 }
  0x2f   : > { %310 = vperm.xlu1 %498, %v192_v2  }
  0x88   : > { %v237_v8 = vpop.permute.xlu0 %236 }
  0x89   : > { %v239_v9 = vsub.f32 %v192_v2, %v237_v8 }
  0x8b   : > { %241 = vrot.lane.b32.xlu0 %v239_v9, %s558_s23 }
  0x8f   : > { %295 = vperm.xlu0 %493, %v192_v2  }
  0x93   : > { %496 = vset.pattern.permute.xlu0 %v559_v10 }
  0x94   : > { %214 = vperm.xlu0 %496, %v192_v2  }
  0x95   : > { %v269_v14 = vpop.permute.xlu1 %268 }
  0x96   : > { %v275_v21 = vadd.f32 %v274_v19, %v269_v14 }
  0x98   : > { %v276_v23 = vmul.f32 0.5, %v275_v21 }
  0x9a   : > { %v282_v16 = vpop.permute.xlu1 %281  ;;  %v277_v26 = vadd.f32 1e-06, %v276_v23 }
  0x9b   : > { %v288_v32 = vsub.f32 %v282_v16, %v287_v27 }
  0x9c   : > { %500 = vrcp.f32 %v277_v26 }
  0x9d   : > { %v289_v36 = vand.u32 2147483647, %v288_v32 }
  0x9f   : > { %v197_v20 = vpop.permute.xlu1 %196  ;;  %v290_v44 = vsub.f32 0.0, %v289_v36 }
  0xa0   : > { %v203_v58 = vmax.f32 %v197_v20, %v202_v49 }
  0xa4   : > { %v206_v22 = vpop.permute.xlu1 %205 }
  0xa5   : > { %v212_v59 = vmax.f32 %v206_v22, %v211_v50 }
  0xa6   : > { %v501_v45 = vpop.eup %500 }
  0xa7   : > { %v291_v53 = vmul.f32 %v501_v45, %v290_v44 }
  0xa9   : > { %v224_v28 = vpop.permute.xlu1 %223  ;;  %v292_v62 = vmul.f32 1.442695, %v291_v53 }
  0xaa   : > { %v230_v60 = vmin.f32 %v224_v28, %v229_v51 }
  0xab   : > { %502 = vpow2.f32 %v292_v62 }
  0xac   : > { %v233_v1 = vsub.f32 %v230_v60, %v212_v59 }
  0xae   : > { %v311_v35 = vpop.permute.xlu1 %310  ;;  %v234_v5 = vmax.f32 %v233_v1, 0.0 }
  0xaf   : > { %v317_v38 = vsub.f32 %v311_v35, %v316_v34 }
  0xb1   : > { %v318_v47 = vand.u32 2147483647, %v317_v38 }
  0xb3   : > { %v319_v56 = vsub.f32 0.0, %v318_v47 }
  0xb5   : > { %v320_v0 = vmul.f32 %v501_v45, %v319_v56 }
  0xb7   : > { %v321_v4 = vmul.f32 1.442695, %v320_v0 }
  0xfd   : > { %v242_v11 = vpop.permute.xlu0 %241 }
  0xfe   : > { %v244_v12 = vmul.f32 %v242_v11, %v239_v9 }
 0x100   : > { %255 = vperm.xlu0 %496, %v244_v12   ;;  %v503_v12 = vpop.eup %502 }
 0x104   : > { %499 = vset.pattern.permute.xlu0 %v557_v7  ;;  %v261_v7 = vrot.slane %v252_v3, %v219_v43 }
 0x10e   : > { %v296_v31 = vpop.permute.xlu0 %295 }
 0x10f   : > { %v302_v33 = vsub.f32 %v296_v31, %v301_v29 }
 0x111   : > { %v303_v37 = vand.u32 2147483647, %v302_v33 }
 0x113   : > { %v304_v46 = vsub.f32 0.0, %v303_v37  ;;  %v215_v54 = vpop.permute.xlu0 %214 }
 0x114   : > { %v221_v61 = vmin.f32 %v215_v54, %v220_v52 }
 0x115   : > { %v305_v55 = vmul.f32 %v501_v45, %v304_v46 }
 0x116   : > { %v231_v2 = vsub.f32 %v221_v61, %v203_v58 }
 0x117   : > { %v306_v63 = vmul.f32 1.442695, %v305_v55 }
 0x118   : > { %v232_v6 = vmax.f32 %v231_v2, 0.0 }
 0x119   : > { %504 = vpow2.f32 %v306_v63 }
 0x11a   : > { %506 = vpow2.f32 %v321_v4  ;;  %v235_v9 = vmul.f32 %v234_v5, %v232_v6 }
 0x123   : > { %v505_v13 = vpop.eup %504 }
 0x124   : > { %v308_v15 = vadd.f32 %v505_v13, %v503_v12  ;;  %v507_v16 = vpop.eup %506 }
 0x126   : > { %v323_v17 = vadd.f32 %v507_v16, %v308_v15 }
 0x128   : > { %v324_v18 = vmul.f32 0.33333334, %v323_v17 }
 0x12a   : > { %v326_v21 = vmul.f32 0.2, %v324_v18 }
 0x17f   : > { %v256_v8 = vpop.permute.xlu0 %255 }
 0x180   : > { %v262_v10 = vadd.f32 %v261_v7, %v256_v8 }
 0x182   : > { %v263_v11 = vsub.f32 %v262_v10, %v235_v9 }
 0x184   : > { %v264_v14 = vmax.f32 %v263_v11, 1e-08 }
 0x186   : > { %508 = vrcp.f32 %v264_v14 }
 0x190   : > { %v509_v19 = vpop.eup %508 }
 0x191   : > { %v266_v20 = vmul.f32 %v509_v19, %v235_v9 }
 0x193   : > { %v325_v22 = vmul.f32 0.8, %v266_v20 }
 0x195   : > { %v327_v23 = vadd.f32 %v326_v21, %v325_v22 }
 0x197   : > { %v328_v24 = vsub.f32 1.0, %v327_v23 }
 0x199   : > { %v329_v25 = vmul.f32 1000.0, %v328_v24 }
 0x19b   : > { %330 = vst [vmem:[%s191_s30] sm:$0xff] %v329_v25 }
 0x19c PF: > { %s12_s13 = sadd.s32 1, %s548_s13   ;;  %s643_s9 = smov %s540_s11 }
 0x19d   : > { %p9_p7 = scmp.ge.s32.totalorder %s12_s13, 6   ;;  %s644_s10 = smov %s544_s12 }
 0x19e   : > { %s645_s11 = smov %s648_s14  ;;  %s646_s12 = smov %s652_s15 }
 0x19f   :  { %11 = sbr.rel (!%p9_p7) target bundleno = 3 (0x3), region = 61 }

</bundles_post_ra>
